<compile_context>
chip_gen: v6e
topology: v6e:2x2x1
jax: 0.10.0
libtpu: 0.0.40
codegen_flags: <defaults>
</compile_context>

<pallas_src>
import functools
import math

import jax
import jax.numpy as jnp
from jax.experimental import pallas as pl
from jax.experimental.pallas import tpu as pltpu


# -----------------------------------------------------------------------------
# Band-size selection (spatial row-band tiling)
# -----------------------------------------------------------------------------
def _pick_band_rows(H, W, max_band_lanes):
    """Largest row count Hb dividing H with Hb*W a multiple of 128 and
    Hb*W <= max_band_lanes.  Falls back to the whole image (single band)."""
    if H * W <= max_band_lanes:
        return H
    for h in range(H, 0, -1):
        if H % h == 0 and (h * W) % 128 == 0 and h * W <= max_band_lanes:
            return h
    # TODO(synk): pad H*W to a multiple of 128 for awkward spatial sizes.
    return H


def _make_bands(x_flat, H, W, Hb):
    """x_flat: (B, H*W) -> (B, nb, 1, (Hb+2)*W) overlapping row bands with a
    1-row zero halo at the image top/bottom (input is 1 channel -> tiny)."""
    nb = H // Hb
    xp = jnp.pad(x_flat, ((0, 0), (W, W)))                   # (B, (H+2)*W)
    if nb == 1:
        return xp[:, None, None, :]
    ext = (Hb + 2) * W
    bands = [xp[:, r * Hb * W: r * Hb * W + ext] for r in range(nb)]
    return jnp.stack(bands, axis=1)[:, :, None, :]


# -----------------------------------------------------------------------------
# The fused ScarNet kernel: per-pixel chain + fusion head on one row band.
# -----------------------------------------------------------------------------
def _scarnet_kernel(x_ref, enc_w_ref, red_w_ref, red_b_ref, att_w_ref,
                    att_b_ref, m2c_w_ref, m2c_b_ref, u1_w_ref, u2_w_ref,
                    u2_b_ref, w3_ref, b3_ref, bn_s_ref, bn_t_ref, w1_ref,
                    b1_ref, o_ref, *, W, Hb):
    C = o_ref.shape[1]
    C2 = 2 * C
    band_px = Hb * W
    ext_px = (Hb + 2) * W
    r = pl.program_id(1)
    nb = pl.num_programs(1)

    def mm(a, b):
        return jnp.dot(a, b, preferred_element_type=jnp.float32)

    # ---- per-pixel chain on the (Hb+2)-row halo band (channels x lanes) ----
    x = x_ref[0, 0]                                          # (1, ext_px)
    xa = jnp.concatenate([x, jnp.ones_like(x)], axis=0)      # (2, ext_px) = [x; 1]

    # MedSAM encoder stand-in (224 ch) + channel_reducer + scar attention.
    feat = jnp.maximum(mm(enc_w_ref[...], xa), 0.0)          # (224, ext)  MXU
    reduced = mm(red_w_ref[...], feat) + red_b_ref[...]      # (32, ext)
    gate = jax.nn.sigmoid(mm(att_w_ref[...], reduced) + att_b_ref[...])
    attended = reduced * gate                                # (32, ext)
    cls = mm(m2c_w_ref[...], attended) + m2c_b_ref[...]      # (C, ext)

    # UNet stand-in: 1 -> 16 (ReLU) -> num_classes.
    uh = jnp.maximum(mm(u1_w_ref[...], xa), 0.0)             # (16, ext)
    ul = mm(u2_w_ref[...], uh) + u2_b_ref[...]               # (C, ext)

    # Both class softmaxes on one stacked (2C, ext) array; EUP reciprocal.
    z = jnp.concatenate(
        [cls - jnp.max(cls, axis=0, keepdims=True),
         ul - jnp.max(ul, axis=0, keepdims=True)], axis=0)
    e = jnp.exp(z)
    inv0 = pl.reciprocal(jnp.sum(e[:C], axis=0, keepdims=True), approx=True)
    inv1 = pl.reciprocal(jnp.sum(e[C:], axis=0, keepdims=True), approx=True)
    cat = jnp.concatenate([e[:C] * inv0, e[C:] * inv1], axis=0)   # (2C, ext)

    # Zero halo rows that fall outside the image (the conv's zero padding).
    lane = jax.lax.broadcasted_iota(jnp.int32, (1, ext_px), 1)
    valid = jnp.logical_and(jnp.logical_or(lane >= W, r > 0),
                            jnp.logical_or(lane < (Hb + 1) * W, r < nb - 1))
    cat = jnp.where(valid, cat, 0.0)

    # ---- fusion head: 3x3 conv (pad=1) + BN(eval) + ReLU + 1x1 conv --------
    # dx = +/-1 taps: two lane rolls of the whole halo'd band, masked once.
    col = lane % W
    cat_w = jnp.where(col > 0, pltpu.roll(cat, shift=1, axis=1), 0.0)
    cat_e = jnp.where(col < W - 1, pltpu.roll(cat, shift=ext_px - 1, axis=1), 0.0)
    taps = (cat_w, cat, cat_e)                               # dx = -1, 0, +1

    # dy = -1/0/+1 taps: static row-offset slices of the halo'd buffers.
    # Accumulate nine (C2, C2) @ (C2, band_px) matmuls (no stacked concat).
    w3 = w3_ref[...]                                         # (C2, 9*C2)
    acc = jnp.zeros((C2, band_px), jnp.float32)
    for dy in (-1, 0, 1):
        off = (dy + 1) * W
        for dx in (-1, 0, 1):
            k = (dy + 1) * 3 + (dx + 1)
            tap = taps[dx + 1][:, off:off + band_px]
            acc = acc + mm(w3[:, k * C2:(k + 1) * C2], tap)

    acc = (acc + b3_ref[...]) * bn_s_ref[...] + bn_t_ref[...]
    acc = jnp.maximum(acc, 0.0)
    out = mm(w1_ref[...], acc) + b1_ref[...]                 # (C, band_px)
    o_ref[...] = out[None].astype(o_ref.dtype)


# -----------------------------------------------------------------------------
# ScarNet forward (single fused pallas_call)
# -----------------------------------------------------------------------------
def scarnet_forward(x_nchw, params, *, max_band_lanes=8192):
    B, Cin, H, W = x_nchw.shape                              # Cin == 1
    C = params["m2c_w"].shape[0]
    HW = H * W
    Hb = _pick_band_rows(H, W, max_band_lanes)
    nb = H // Hb
    band_px = Hb * W
    ext_px = (Hb + 2) * W

    x_flat = x_nchw.reshape(B, HW).astype(jnp.float32)
    x_bands = _make_bands(x_flat, H, W, Hb)                  # (B, nb, 1, ext_px)

    weight_names = ("enc_w", "red_w", "red_b", "att_w", "att_b",
                    "m2c_w", "m2c_b", "unet_w1", "unet_w2", "unet_b2",
                    "fuse_w3", "fuse_b3", "bn_scale", "bn_shift",
                    "fuse_w1", "fuse_b1")
    weights = tuple(params[k] for k in weight_names)

    def const_spec(arr):
        return pl.BlockSpec(arr.shape, lambda b, r: (0, 0))

    in_specs = [pl.BlockSpec((1, 1, 1, ext_px), lambda b, r: (b, r, 0, 0))]
    in_specs += [const_spec(w) for w in weights]

    out = pl.pallas_call(
        functools.partial(_scarnet_kernel, W=W, Hb=Hb),
        out_shape=jax.ShapeDtypeStruct((B, C, HW), jnp.float32),
        grid=(B, nb),
        in_specs=in_specs,
        out_specs=pl.BlockSpec((1, C, band_px), lambda b, r: (b, 0, r)),
        compiler_params=pltpu.CompilerParams(
            dimension_semantics=("parallel", "parallel"),
            vmem_limit_bytes=40 * 1024 * 1024),
    )(x_bands, *weights)
    return out.reshape(B, C, H, W)                           # free reshape


# -----------------------------------------------------------------------------
# Pure-JAX reference (same parameters / math) for validation
# -----------------------------------------------------------------------------
def scarnet_reference(x_nchw, params):
    B, _, H, W = x_nchw.shape
    C = params["m2c_w"].shape[0]
    C2 = 2 * C
    x = x_nchw.reshape(B, 1, H * W).astype(jnp.float32)
    xa = jnp.concatenate([x, jnp.ones_like(x)], axis=1)      # (B, 2, HW)

    def conv1x1(w, v):
        return jnp.einsum("oc,bcp->bop", w, v)

    feat = jax.nn.relu(conv1x1(params["enc_w"], xa))
    red = conv1x1(params["red_w"], feat) + params["red_b"][None]
    att = red * jax.nn.sigmoid(conv1x1(params["att_w"], red) + params["att_b"][None])
    cls = conv1x1(params["m2c_w"], att) + params["m2c_b"][None]
    uh = jax.nn.relu(conv1x1(params["unet_w1"], xa))
    ul = conv1x1(params["unet_w2"], uh) + params["unet_b2"][None]
    cat = jnp.concatenate([jax.nn.softmax(cls, axis=1),
                           jax.nn.softmax(ul, axis=1)], axis=1)
    cat = cat.reshape(B, C2, H, W)

    w3 = params["fuse_w3"].reshape(C2, 3, 3, C2).transpose(0, 3, 1, 2)  # OIHW
    y = jax.lax.conv_general_dilated(
        cat, w3, (1, 1), "SAME", dimension_numbers=("NCHW", "OIHW", "NCHW"))
    y = (y + params["fuse_b3"].reshape(1, C2, 1, 1)) * \
        params["bn_scale"].reshape(1, C2, 1, 1) + params["bn_shift"].reshape(1, C2, 1, 1)
    y = jax.nn.relu(y)
    out = jnp.einsum("oc,bchw->bohw", params["fuse_w1"], y) + \
        params["fuse_b1"].reshape(1, C, 1, 1)
    return out


# -----------------------------------------------------------------------------
# Deterministic parameter init (channels-first weight layouts)
# -----------------------------------------------------------------------------
def init_params(key, num_classes=4):
    ks = jax.random.split(key, 8)
    C = num_classes
    C2 = 2 * C

    def kaiming(k, shape, fan_out):
        return math.sqrt(2.0 / fan_out) * jax.random.normal(k, shape, jnp.float32)

    p = {}
    # MedSAM encoder stand-in (64+96+64 = 224 channels): bias folded into the
    # augmented [x; 1] column so the whole layer is one MXU matmul.
    p["enc_w"] = jnp.concatenate(
        [0.1 * jax.random.normal(ks[0], (224, 1), jnp.float32),
         jnp.zeros((224, 1), jnp.float32)], axis=1)                  # (224, 2)
    # channel_reducer: Conv2d(224 -> 32, k=1), kaiming fan_out, bias 0.
    p["red_w"] = kaiming(ks[1], (32, 224), fan_out=32)
    p["red_b"] = jnp.zeros((32, 1), jnp.float32)
    # MultiScaleScarAttention(32) stand-in: x * sigmoid(conv1x1(x)).
    p["att_w"] = 0.1 * jax.random.normal(ks[2], (32, 32), jnp.float32)
    p["att_b"] = jnp.zeros((32, 1), jnp.float32)
    # UNet stand-in: 1 -> 16 (ReLU) -> num_classes, bias folded into [x; 1].
    p["unet_w1"] = jnp.concatenate(
        [0.1 * jax.random.normal(ks[3], (16, 1), jnp.float32),
         jnp.zeros((16, 1), jnp.float32)], axis=1)                   # (16, 2)
    p["unet_w2"] = 0.1 * jax.random.normal(ks[4], (C, 16), jnp.float32)
    p["unet_b2"] = jnp.zeros((C, 1), jnp.float32)
    # medsam_to_classes stand-in: fixed deterministic 1x1 conv 32 -> C.
    p["m2c_w"] = 0.1 * jax.random.normal(ks[5], (C, 32), jnp.float32)
    p["m2c_b"] = jnp.zeros((C, 1), jnp.float32)

    # fusion[0]: Conv2d(C2 -> C2, 3x3, pad=1), stored as (Cout, 9*Cin) with
    # kernel-position-major blocks (ky*3 + kx), matching the kernel's taps.
    w3 = kaiming(ks[6], (C2, C2, 3, 3), fan_out=C2 * 9)
    p["fuse_w3"] = jnp.transpose(w3, (0, 2, 3, 1)).reshape(C2, 9 * C2)
    p["fuse_b3"] = jnp.zeros((C2, 1), jnp.float32)

    # fusion[1]: BatchNorm2d(C2), eval-mode fold (gamma=1, beta=0, mu=0, var=1).
    eps = 1e-5
    gamma = jnp.ones((C2,), jnp.float32)
    beta = jnp.zeros((C2,), jnp.float32)
    mean = jnp.zeros((C2,), jnp.float32)
    var = jnp.ones((C2,), jnp.float32)
    scale = gamma / jnp.sqrt(var + eps)
    p["bn_scale"] = scale.reshape(C2, 1)
    p["bn_shift"] = (beta - mean * scale).reshape(C2, 1)

    # fusion[3]: Conv2d(C2 -> C, k=1).
    p["fuse_w1"] = kaiming(ks[7], (C, C2), fan_out=C)
    p["fuse_b1"] = jnp.zeros((C, 1), jnp.float32)
    return p


if __name__ == "__main__":
    key = jax.random.PRNGKey(0)
    pkey, xkey = jax.random.split(key)
    num_classes = 4
    params = init_params(pkey, num_classes=num_classes)

    B, H, W = 2, 16, 16
    x = jax.random.normal(xkey, (B, 1, H, W), jnp.float32)   # [B, 1, H, W]

    fwd = jax.jit(scarnet_forward, static_argnames=("max_band_lanes",))
    # Single-band path (whole image fits one band).
    out_single = jax.block_until_ready(fwd(x, params, max_band_lanes=8192))
    # Banded path (forces nb=2 row bands with halo recompute).
    out_banded = jax.block_until_ready(fwd(x, params, max_band_lanes=128))
    ref = jax.block_until_ready(jax.jit(scarnet_reference)(x, params))

    assert out_single.shape == (B, num_classes, H, W), out_single.shape
    assert out_banded.shape == (B, num_classes, H, W), out_banded.shape
    assert bool(jnp.all(jnp.isfinite(out_single)))
    assert bool(jnp.all(jnp.isfinite(out_banded)))
    assert float(jnp.max(jnp.abs(out_single - ref))) < 5e-2
    assert float(jnp.max(jnp.abs(out_banded - ref))) < 5e-2
    print("KERNEL_OK")
</pallas_src>

<mosaic_0001>
module attributes {stable_mosaic.version = 11 : i64} {
  func.func @_scarnet_kernel(%arg0: i32, %arg1: i32, %arg2: memref<1x1x1x288xf32, #tpu.memory_space<vmem>>, %arg3: memref<224x2xf32, #tpu.memory_space<vmem>>, %arg4: memref<32x224xf32, #tpu.memory_space<vmem>>, %arg5: memref<32x1xf32, #tpu.memory_space<vmem>>, %arg6: memref<32x32xf32, #tpu.memory_space<vmem>>, %arg7: memref<32x1xf32, #tpu.memory_space<vmem>>, %arg8: memref<4x32xf32, #tpu.memory_space<vmem>>, %arg9: memref<4x1xf32, #tpu.memory_space<vmem>>, %arg10: memref<16x2xf32, #tpu.memory_space<vmem>>, %arg11: memref<4x16xf32, #tpu.memory_space<vmem>>, %arg12: memref<4x1xf32, #tpu.memory_space<vmem>>, %arg13: memref<8x72xf32, #tpu.memory_space<vmem>>, %arg14: memref<8x1xf32, #tpu.memory_space<vmem>>, %arg15: memref<8x1xf32, #tpu.memory_space<vmem>>, %arg16: memref<8x1xf32, #tpu.memory_space<vmem>>, %arg17: memref<4x8xf32, #tpu.memory_space<vmem>>, %arg18: memref<4x1xf32, #tpu.memory_space<vmem>>, %arg19: memref<1x4x256xf32, #tpu.memory_space<vmem>>) attributes {dimension_semantics = [#tpu.dimension_semantics<parallel>, #tpu.dimension_semantics<parallel>], iteration_bounds = array<i64: 2, 1>, scalar_prefetch = 0 : i64, scratch_operands = 0 : i64, tpu.core_type = #tpu.core_type<tc>, window_params = [{transform_indices = @transform_0, window_bounds = array<i64: 1, 1, 1, 288>}, {pipeline_mode = #tpu.pipeline_mode<synchronous>, transform_indices = @transform_1, window_bounds = array<i64: 224, 2>}, {pipeline_mode = #tpu.pipeline_mode<synchronous>, transform_indices = @transform_2, window_bounds = array<i64: 32, 224>}, {pipeline_mode = #tpu.pipeline_mode<synchronous>, transform_indices = @transform_3, window_bounds = array<i64: 32, 1>}, {pipeline_mode = #tpu.pipeline_mode<synchronous>, transform_indices = @transform_4, window_bounds = array<i64: 32, 32>}, {pipeline_mode = #tpu.pipeline_mode<synchronous>, transform_indices = @transform_5, window_bounds = array<i64: 32, 1>}, {pipeline_mode = #tpu.pipeline_mode<synchronous>, transform_indices = @transform_6, window_bounds = array<i64: 4, 32>}, {pipeline_mode = #tpu.pipeline_mode<synchronous>, transform_indices = @transform_7, window_bounds = array<i64: 4, 1>}, {pipeline_mode = #tpu.pipeline_mode<synchronous>, transform_indices = @transform_8, window_bounds = array<i64: 16, 2>}, {pipeline_mode = #tpu.pipeline_mode<synchronous>, transform_indices = @transform_9, window_bounds = array<i64: 4, 16>}, {pipeline_mode = #tpu.pipeline_mode<synchronous>, transform_indices = @transform_10, window_bounds = array<i64: 4, 1>}, {pipeline_mode = #tpu.pipeline_mode<synchronous>, transform_indices = @transform_11, window_bounds = array<i64: 8, 72>}, {pipeline_mode = #tpu.pipeline_mode<synchronous>, transform_indices = @transform_12, window_bounds = array<i64: 8, 1>}, {pipeline_mode = #tpu.pipeline_mode<synchronous>, transform_indices = @transform_13, window_bounds = array<i64: 8, 1>}, {pipeline_mode = #tpu.pipeline_mode<synchronous>, transform_indices = @transform_14, window_bounds = array<i64: 8, 1>}, {pipeline_mode = #tpu.pipeline_mode<synchronous>, transform_indices = @transform_15, window_bounds = array<i64: 4, 8>}, {pipeline_mode = #tpu.pipeline_mode<synchronous>, transform_indices = @transform_16, window_bounds = array<i64: 4, 1>}, {transform_indices = @transform_17, window_bounds = array<i64: 1, 4, 256>}]} {
    %c0 = arith.constant 0 : index
    %c0_0 = arith.constant 0 : index
    %c0_1 = arith.constant 0 : index
    %c0_2 = arith.constant 0 : index
    %0 = vector.load %arg2[%c0, %c0_0, %c0_1, %c0_2] : memref<1x1x1x288xf32, #tpu.memory_space<vmem>>, vector<1x1x1x288xf32>
    %1 = vector.shape_cast %0 : vector<1x1x1x288xf32> to vector<1x288xf32>
    %cst = arith.constant 1.000000e+00 : f32
    %2 = vector.broadcast %cst : f32 to vector<1x288xf32>
    %3 = tpu.concatenate %1, %2 in 0 : vector<1x288xf32>, vector<1x288xf32> -> vector<2x288xf32>
    %c0_3 = arith.constant 0 : index
    %c0_4 = arith.constant 0 : index
    %4 = vector.load %arg3[%c0_3, %c0_4] : memref<224x2xf32, #tpu.memory_space<vmem>>, vector<224x2xf32>
    %cst_5 = arith.constant dense<0.000000e+00> : vector<224x288xf32>
    %5 = tpu.matmul %4, %3, %cst_5 {dimension_numbers = #tpu.dot_dimension_numbers<[1], [0], [0], [1], [0, 0, 1, 1], [], []>} : vector<224x2xf32>, vector<2x288xf32>, vector<224x288xf32> -> vector<224x288xf32>
    %cst_6 = arith.constant 0.000000e+00 : f32
    %6 = vector.broadcast %cst_6 : f32 to vector<224x288xf32>
    %7 = arith.maximumf %5, %6 : vector<224x288xf32>
    %c0_7 = arith.constant 0 : index
    %c0_8 = arith.constant 0 : index
    %8 = vector.load %arg4[%c0_7, %c0_8] : memref<32x224xf32, #tpu.memory_space<vmem>>, vector<32x224xf32>
    %cst_9 = arith.constant dense<0.000000e+00> : vector<32x288xf32>
    %9 = tpu.matmul %8, %7, %cst_9 {dimension_numbers = #tpu.dot_dimension_numbers<[1], [0], [0], [1], [0, 0, 1, 1], [], []>} : vector<32x224xf32>, vector<224x288xf32>, vector<32x288xf32> -> vector<32x288xf32>
    %c0_10 = arith.constant 0 : index
    %c0_11 = arith.constant 0 : index
    %10 = vector.load %arg5[%c0_10, %c0_11] : memref<32x1xf32, #tpu.memory_space<vmem>>, vector<32x1xf32>
    %11 = vector.broadcast %10 : vector<32x1xf32> to vector<32x288xf32>
    %12 = arith.addf %9, %11 : vector<32x288xf32>
    %c0_12 = arith.constant 0 : index
    %c0_13 = arith.constant 0 : index
    %13 = vector.load %arg6[%c0_12, %c0_13] : memref<32x32xf32, #tpu.memory_space<vmem>>, vector<32x32xf32>
    %cst_14 = arith.constant dense<0.000000e+00> : vector<32x288xf32>
    %14 = tpu.matmul %13, %12, %cst_14 {dimension_numbers = #tpu.dot_dimension_numbers<[1], [0], [0], [1], [0, 0, 1, 1], [], []>} : vector<32x32xf32>, vector<32x288xf32>, vector<32x288xf32> -> vector<32x288xf32>
    %c0_15 = arith.constant 0 : index
    %c0_16 = arith.constant 0 : index
    %15 = vector.load %arg7[%c0_15, %c0_16] : memref<32x1xf32, #tpu.memory_space<vmem>>, vector<32x1xf32>
    %16 = vector.broadcast %15 : vector<32x1xf32> to vector<32x288xf32>
    %17 = arith.addf %14, %16 : vector<32x288xf32>
    %18 = arith.negf %17 : vector<32x288xf32>
    %19 = math.exp %18 : vector<32x288xf32>
    %cst_17 = arith.constant 1.000000e+00 : f32
    %20 = vector.broadcast %cst_17 : f32 to vector<32x288xf32>
    %21 = arith.addf %20, %19 : vector<32x288xf32>
    %22 = arith.divf %20, %21 : vector<32x288xf32>
    %23 = arith.mulf %12, %22 : vector<32x288xf32>
    %c0_18 = arith.constant 0 : index
    %c0_19 = arith.constant 0 : index
    %24 = vector.load %arg8[%c0_18, %c0_19] : memref<4x32xf32, #tpu.memory_space<vmem>>, vector<4x32xf32>
    %cst_20 = arith.constant dense<0.000000e+00> : vector<4x288xf32>
    %25 = tpu.matmul %24, %23, %cst_20 {dimension_numbers = #tpu.dot_dimension_numbers<[1], [0], [0], [1], [0, 0, 1, 1], [], []>} : vector<4x32xf32>, vector<32x288xf32>, vector<4x288xf32> -> vector<4x288xf32>
    %c0_21 = arith.constant 0 : index
    %c0_22 = arith.constant 0 : index
    %26 = vector.load %arg9[%c0_21, %c0_22] : memref<4x1xf32, #tpu.memory_space<vmem>>, vector<4x1xf32>
    %27 = vector.broadcast %26 : vector<4x1xf32> to vector<4x288xf32>
    %28 = arith.addf %25, %27 : vector<4x288xf32>
    %c0_23 = arith.constant 0 : index
    %c0_24 = arith.constant 0 : index
    %29 = vector.load %arg10[%c0_23, %c0_24] : memref<16x2xf32, #tpu.memory_space<vmem>>, vector<16x2xf32>
    %cst_25 = arith.constant dense<0.000000e+00> : vector<16x288xf32>
    %30 = tpu.matmul %29, %3, %cst_25 {dimension_numbers = #tpu.dot_dimension_numbers<[1], [0], [0], [1], [0, 0, 1, 1], [], []>} : vector<16x2xf32>, vector<2x288xf32>, vector<16x288xf32> -> vector<16x288xf32>
    %cst_26 = arith.constant 0.000000e+00 : f32
    %31 = vector.broadcast %cst_26 : f32 to vector<16x288xf32>
    %32 = arith.maximumf %30, %31 : vector<16x288xf32>
    %c0_27 = arith.constant 0 : index
    %c0_28 = arith.constant 0 : index
    %33 = vector.load %arg11[%c0_27, %c0_28] : memref<4x16xf32, #tpu.memory_space<vmem>>, vector<4x16xf32>
    %cst_29 = arith.constant dense<0.000000e+00> : vector<4x288xf32>
    %34 = tpu.matmul %33, %32, %cst_29 {dimension_numbers = #tpu.dot_dimension_numbers<[1], [0], [0], [1], [0, 0, 1, 1], [], []>} : vector<4x16xf32>, vector<16x288xf32>, vector<4x288xf32> -> vector<4x288xf32>
    %c0_30 = arith.constant 0 : index
    %c0_31 = arith.constant 0 : index
    %35 = vector.load %arg12[%c0_30, %c0_31] : memref<4x1xf32, #tpu.memory_space<vmem>>, vector<4x1xf32>
    %36 = vector.broadcast %35 : vector<4x1xf32> to vector<4x288xf32>
    %37 = arith.addf %34, %36 : vector<4x288xf32>
    %cst_32 = arith.constant dense<0xFF800000> : vector<288xf32>
    %38 = vector.multi_reduction <maximumf>, %28, %cst_32 [0] : vector<4x288xf32> to vector<288xf32>
    %39 = vector.shape_cast %38 : vector<288xf32> to vector<1x288xf32>
    %40 = vector.broadcast %39 : vector<1x288xf32> to vector<4x288xf32>
    %41 = arith.subf %28, %40 : vector<4x288xf32>
    %cst_33 = arith.constant dense<0xFF800000> : vector<288xf32>
    %42 = vector.multi_reduction <maximumf>, %37, %cst_33 [0] : vector<4x288xf32> to vector<288xf32>
    %43 = vector.shape_cast %42 : vector<288xf32> to vector<1x288xf32>
    %44 = vector.broadcast %43 : vector<1x288xf32> to vector<4x288xf32>
    %45 = arith.subf %37, %44 : vector<4x288xf32>
    %46 = tpu.concatenate %41, %45 in 0 : vector<4x288xf32>, vector<4x288xf32> -> vector<8x288xf32>
    %47 = math.exp %46 : vector<8x288xf32>
    %48 = vector.extract_strided_slice %47 {offsets = [0, 0], sizes = [4, 288], strides = [1, 1]} : vector<8x288xf32> to vector<4x288xf32>
    %cst_34 = arith.constant dense<0.000000e+00> : vector<288xf32>
    %49 = vector.multi_reduction <add>, %48, %cst_34 [0] : vector<4x288xf32> to vector<288xf32>
    %50 = vector.shape_cast %49 : vector<288xf32> to vector<1x288xf32>
    %51 = tpu.reciprocal %50 {approx = true} : vector<1x288xf32> -> vector<1x288xf32>
    %52 = vector.extract_strided_slice %47 {offsets = [4, 0], sizes = [4, 288], strides = [1, 1]} : vector<8x288xf32> to vector<4x288xf32>
    %cst_35 = arith.constant dense<0.000000e+00> : vector<288xf32>
    %53 = vector.multi_reduction <add>, %52, %cst_35 [0] : vector<4x288xf32> to vector<288xf32>
    %54 = vector.shape_cast %53 : vector<288xf32> to vector<1x288xf32>
    %55 = tpu.reciprocal %54 {approx = true} : vector<1x288xf32> -> vector<1x288xf32>
    %56 = vector.extract_strided_slice %47 {offsets = [0, 0], sizes = [4, 288], strides = [1, 1]} : vector<8x288xf32> to vector<4x288xf32>
    %57 = vector.broadcast %51 : vector<1x288xf32> to vector<4x288xf32>
    %58 = arith.mulf %56, %57 : vector<4x288xf32>
    %59 = vector.extract_strided_slice %47 {offsets = [4, 0], sizes = [4, 288], strides = [1, 1]} : vector<8x288xf32> to vector<4x288xf32>
    %60 = vector.broadcast %55 : vector<1x288xf32> to vector<4x288xf32>
    %61 = arith.mulf %59, %60 : vector<4x288xf32>
    %62 = tpu.concatenate %58, %61 in 0 : vector<4x288xf32>, vector<4x288xf32> -> vector<8x288xf32>
    %63 = tpu.iota {dimensions = array<i32: 1>} : vector<1x288xi32>
    %c16_i32 = arith.constant 16 : i32
    %64 = vector.broadcast %c16_i32 : i32 to vector<1x288xi32>
    %65 = arith.cmpi sge, %63, %64 : vector<1x288xi32>
    %c0_i32 = arith.constant 0 : i32
    %66 = arith.cmpi sgt, %arg1, %c0_i32 : i32
    %67 = vector.broadcast %66 : i1 to vector<1x288xi1>
    %68 = arith.ori %65, %67 : vector<1x288xi1>
    %c272_i32 = arith.constant 272 : i32
    %69 = vector.broadcast %c272_i32 : i32 to vector<1x288xi32>
    %70 = arith.cmpi slt, %63, %69 : vector<1x288xi32>
    %c0_i32_36 = arith.constant 0 : i32
    %71 = arith.cmpi slt, %arg1, %c0_i32_36 : i32
    %72 = vector.broadcast %71 : i1 to vector<1x288xi1>
    %73 = arith.ori %70, %72 : vector<1x288xi1>
    %74 = arith.andi %68, %73 : vector<1x288xi1>
    %cst_37 = arith.constant 0.000000e+00 : f32
    %75 = vector.shape_cast %74 : vector<1x288xi1> to vector<1x288xi1>
    %76 = vector.broadcast %75 : vector<1x288xi1> to vector<8x288xi1>
    %77 = vector.broadcast %cst_37 : f32 to vector<8x288xf32>
    %78 = arith.select %76, %62, %77 : vector<8x288xi1>, vector<8x288xf32>
    %c16_i32_38 = arith.constant 16 : i32
    %c0_i32_39 = arith.constant 0 : i32
    %79 = arith.cmpi eq, %c16_i32_38, %c0_i32_39 : i32
    %c1_i32 = arith.constant 1 : i32
    %80 = arith.select %79, %c1_i32, %c16_i32_38 : i32
    %81 = vector.broadcast %80 : i32 to vector<1x288xi32>
    %82 = arith.remsi %63, %81 : vector<1x288xi32>
    %c0_i32_40 = arith.constant 0 : i32
    %83 = vector.broadcast %c0_i32_40 : i32 to vector<1x288xi32>
    %84 = arith.cmpi ne, %82, %83 : vector<1x288xi32>
    %c0_i32_41 = arith.constant 0 : i32
    %85 = vector.broadcast %c0_i32_41 : i32 to vector<1x288xi32>
    %86 = arith.cmpi slt, %82, %85 : vector<1x288xi32>
    %c0_i32_42 = arith.constant 0 : i32
    %87 = arith.cmpi slt, %80, %c0_i32_42 : i32
    %88 = vector.broadcast %87 : i1 to vector<1x288xi1>
    %89 = vector.broadcast %88 : vector<1x288xi1> to vector<1x288xi1>
    %90 = arith.xori %86, %89 : vector<1x288xi1>
    %91 = arith.andi %90, %84 : vector<1x288xi1>
    %92 = vector.broadcast %80 : i32 to vector<1x288xi32>
    %93 = arith.addi %82, %92 : vector<1x288xi32>
    %94 = arith.select %91, %93, %82 : vector<1x288xi1>, vector<1x288xi32>
    %c0_i32_43 = arith.constant 0 : i32
    %95 = vector.broadcast %c0_i32_43 : i32 to vector<1x288xi32>
    %96 = arith.cmpi sgt, %94, %95 : vector<1x288xi32>
    %c1_i32_44 = arith.constant 1 : i32
    %97 = tpu.dynamic_rotate %78 by %c1_i32_44 dim 1 : vector<8x288xf32>, i32 -> vector<8x288xf32>
    %cst_45 = arith.constant 0.000000e+00 : f32
    %98 = vector.shape_cast %96 : vector<1x288xi1> to vector<1x288xi1>
    %99 = vector.broadcast %98 : vector<1x288xi1> to vector<8x288xi1>
    %100 = vector.broadcast %cst_45 : f32 to vector<8x288xf32>
    %101 = arith.select %99, %97, %100 : vector<8x288xi1>, vector<8x288xf32>
    %c15_i32 = arith.constant 15 : i32
    %102 = vector.broadcast %c15_i32 : i32 to vector<1x288xi32>
    %103 = arith.cmpi slt, %94, %102 : vector<1x288xi32>
    %c287_i32 = arith.constant 287 : i32
    %104 = tpu.dynamic_rotate %78 by %c287_i32 dim 1 : vector<8x288xf32>, i32 -> vector<8x288xf32>
    %cst_46 = arith.constant 0.000000e+00 : f32
    %105 = vector.shape_cast %103 : vector<1x288xi1> to vector<1x288xi1>
    %106 = vector.broadcast %105 : vector<1x288xi1> to vector<8x288xi1>
    %107 = vector.broadcast %cst_46 : f32 to vector<8x288xf32>
    %108 = arith.select %106, %104, %107 : vector<8x288xi1>, vector<8x288xf32>
    %c0_47 = arith.constant 0 : index
    %c0_48 = arith.constant 0 : index
    %109 = vector.load %arg13[%c0_47, %c0_48] : memref<8x72xf32, #tpu.memory_space<vmem>>, vector<8x72xf32>
    %cst_49 = arith.constant 0.000000e+00 : f32
    %110 = vector.broadcast %cst_49 : f32 to vector<8x256xf32>
    %111 = vector.extract_strided_slice %101 {offsets = [0, 0], sizes = [8, 256], strides = [1, 1]} : vector<8x288xf32> to vector<8x256xf32>
    %112 = vector.extract_strided_slice %109 {offsets = [0, 0], sizes = [8, 8], strides = [1, 1]} : vector<8x72xf32> to vector<8x8xf32>
    %cst_50 = arith.constant dense<0.000000e+00> : vector<8x256xf32>
    %113 = tpu.matmul %112, %111, %cst_50 {dimension_numbers = #tpu.dot_dimension_numbers<[1], [0], [0], [1], [0, 0, 1, 1], [], []>} : vector<8x8xf32>, vector<8x256xf32>, vector<8x256xf32> -> vector<8x256xf32>
    %114 = arith.addf %110, %113 : vector<8x256xf32>
    %115 = vector.extract_strided_slice %78 {offsets = [0, 0], sizes = [8, 256], strides = [1, 1]} : vector<8x288xf32> to vector<8x256xf32>
    %116 = vector.extract_strided_slice %109 {offsets = [0, 8], sizes = [8, 8], strides = [1, 1]} : vector<8x72xf32> to vector<8x8xf32>
    %cst_51 = arith.constant dense<0.000000e+00> : vector<8x256xf32>
    %117 = tpu.matmul %116, %115, %cst_51 {dimension_numbers = #tpu.dot_dimension_numbers<[1], [0], [0], [1], [0, 0, 1, 1], [], []>} : vector<8x8xf32>, vector<8x256xf32>, vector<8x256xf32> -> vector<8x256xf32>
    %118 = arith.addf %114, %117 : vector<8x256xf32>
    %119 = vector.extract_strided_slice %108 {offsets = [0, 0], sizes = [8, 256], strides = [1, 1]} : vector<8x288xf32> to vector<8x256xf32>
    %120 = vector.extract_strided_slice %109 {offsets = [0, 16], sizes = [8, 8], strides = [1, 1]} : vector<8x72xf32> to vector<8x8xf32>
    %cst_52 = arith.constant dense<0.000000e+00> : vector<8x256xf32>
    %121 = tpu.matmul %120, %119, %cst_52 {dimension_numbers = #tpu.dot_dimension_numbers<[1], [0], [0], [1], [0, 0, 1, 1], [], []>} : vector<8x8xf32>, vector<8x256xf32>, vector<8x256xf32> -> vector<8x256xf32>
    %122 = arith.addf %118, %121 : vector<8x256xf32>
    %123 = vector.extract_strided_slice %101 {offsets = [0, 16], sizes = [8, 256], strides = [1, 1]} : vector<8x288xf32> to vector<8x256xf32>
    %124 = vector.extract_strided_slice %109 {offsets = [0, 24], sizes = [8, 8], strides = [1, 1]} : vector<8x72xf32> to vector<8x8xf32>
    %cst_53 = arith.constant dense<0.000000e+00> : vector<8x256xf32>
    %125 = tpu.matmul %124, %123, %cst_53 {dimension_numbers = #tpu.dot_dimension_numbers<[1], [0], [0], [1], [0, 0, 1, 1], [], []>} : vector<8x8xf32>, vector<8x256xf32>, vector<8x256xf32> -> vector<8x256xf32>
    %126 = arith.addf %122, %125 : vector<8x256xf32>
    %127 = vector.extract_strided_slice %78 {offsets = [0, 16], sizes = [8, 256], strides = [1, 1]} : vector<8x288xf32> to vector<8x256xf32>
    %128 = vector.extract_strided_slice %109 {offsets = [0, 32], sizes = [8, 8], strides = [1, 1]} : vector<8x72xf32> to vector<8x8xf32>
    %cst_54 = arith.constant dense<0.000000e+00> : vector<8x256xf32>
    %129 = tpu.matmul %128, %127, %cst_54 {dimension_numbers = #tpu.dot_dimension_numbers<[1], [0], [0], [1], [0, 0, 1, 1], [], []>} : vector<8x8xf32>, vector<8x256xf32>, vector<8x256xf32> -> vector<8x256xf32>
    %130 = arith.addf %126, %129 : vector<8x256xf32>
    %131 = vector.extract_strided_slice %108 {offsets = [0, 16], sizes = [8, 256], strides = [1, 1]} : vector<8x288xf32> to vector<8x256xf32>
    %132 = vector.extract_strided_slice %109 {offsets = [0, 40], sizes = [8, 8], strides = [1, 1]} : vector<8x72xf32> to vector<8x8xf32>
    %cst_55 = arith.constant dense<0.000000e+00> : vector<8x256xf32>
    %133 = tpu.matmul %132, %131, %cst_55 {dimension_numbers = #tpu.dot_dimension_numbers<[1], [0], [0], [1], [0, 0, 1, 1], [], []>} : vector<8x8xf32>, vector<8x256xf32>, vector<8x256xf32> -> vector<8x256xf32>
    %134 = arith.addf %130, %133 : vector<8x256xf32>
    %135 = vector.extract_strided_slice %101 {offsets = [0, 32], sizes = [8, 256], strides = [1, 1]} : vector<8x288xf32> to vector<8x256xf32>
    %136 = vector.extract_strided_slice %109 {offsets = [0, 48], sizes = [8, 8], strides = [1, 1]} : vector<8x72xf32> to vector<8x8xf32>
    %cst_56 = arith.constant dense<0.000000e+00> : vector<8x256xf32>
    %137 = tpu.matmul %136, %135, %cst_56 {dimension_numbers = #tpu.dot_dimension_numbers<[1], [0], [0], [1], [0, 0, 1, 1], [], []>} : vector<8x8xf32>, vector<8x256xf32>, vector<8x256xf32> -> vector<8x256xf32>
    %138 = arith.addf %134, %137 : vector<8x256xf32>
    %139 = vector.extract_strided_slice %78 {offsets = [0, 32], sizes = [8, 256], strides = [1, 1]} : vector<8x288xf32> to vector<8x256xf32>
    %140 = vector.extract_strided_slice %109 {offsets = [0, 56], sizes = [8, 8], strides = [1, 1]} : vector<8x72xf32> to vector<8x8xf32>
    %cst_57 = arith.constant dense<0.000000e+00> : vector<8x256xf32>
    %141 = tpu.matmul %140, %139, %cst_57 {dimension_numbers = #tpu.dot_dimension_numbers<[1], [0], [0], [1], [0, 0, 1, 1], [], []>} : vector<8x8xf32>, vector<8x256xf32>, vector<8x256xf32> -> vector<8x256xf32>
    %142 = arith.addf %138, %141 : vector<8x256xf32>
    %143 = vector.extract_strided_slice %108 {offsets = [0, 32], sizes = [8, 256], strides = [1, 1]} : vector<8x288xf32> to vector<8x256xf32>
    %144 = vector.extract_strided_slice %109 {offsets = [0, 64], sizes = [8, 8], strides = [1, 1]} : vector<8x72xf32> to vector<8x8xf32>
    %cst_58 = arith.constant dense<0.000000e+00> : vector<8x256xf32>
    %145 = tpu.matmul %144, %143, %cst_58 {dimension_numbers = #tpu.dot_dimension_numbers<[1], [0], [0], [1], [0, 0, 1, 1], [], []>} : vector<8x8xf32>, vector<8x256xf32>, vector<8x256xf32> -> vector<8x256xf32>
    %146 = arith.addf %142, %145 : vector<8x256xf32>
    %c0_59 = arith.constant 0 : index
    %c0_60 = arith.constant 0 : index
    %147 = vector.load %arg14[%c0_59, %c0_60] : memref<8x1xf32, #tpu.memory_space<vmem>>, vector<8x1xf32>
    %148 = vector.broadcast %147 : vector<8x1xf32> to vector<8x256xf32>
    %149 = arith.addf %146, %148 : vector<8x256xf32>
    %c0_61 = arith.constant 0 : index
    %c0_62 = arith.constant 0 : index
    %150 = vector.load %arg15[%c0_61, %c0_62] : memref<8x1xf32, #tpu.memory_space<vmem>>, vector<8x1xf32>
    %151 = vector.broadcast %150 : vector<8x1xf32> to vector<8x256xf32>
    %152 = arith.mulf %149, %151 : vector<8x256xf32>
    %c0_63 = arith.constant 0 : index
    %c0_64 = arith.constant 0 : index
    %153 = vector.load %arg16[%c0_63, %c0_64] : memref<8x1xf32, #tpu.memory_space<vmem>>, vector<8x1xf32>
    %154 = vector.broadcast %153 : vector<8x1xf32> to vector<8x256xf32>
    %155 = arith.addf %152, %154 : vector<8x256xf32>
    %cst_65 = arith.constant 0.000000e+00 : f32
    %156 = vector.broadcast %cst_65 : f32 to vector<8x256xf32>
    %157 = arith.maximumf %155, %156 : vector<8x256xf32>
    %c0_66 = arith.constant 0 : index
    %c0_67 = arith.constant 0 : index
    %158 = vector.load %arg17[%c0_66, %c0_67] : memref<4x8xf32, #tpu.memory_space<vmem>>, vector<4x8xf32>
    %cst_68 = arith.constant dense<0.000000e+00> : vector<4x256xf32>
    %159 = tpu.matmul %158, %157, %cst_68 {dimension_numbers = #tpu.dot_dimension_numbers<[1], [0], [0], [1], [0, 0, 1, 1], [], []>} : vector<4x8xf32>, vector<8x256xf32>, vector<4x256xf32> -> vector<4x256xf32>
    %c0_69 = arith.constant 0 : index
    %c0_70 = arith.constant 0 : index
    %160 = vector.load %arg18[%c0_69, %c0_70] : memref<4x1xf32, #tpu.memory_space<vmem>>, vector<4x1xf32>
    %161 = vector.broadcast %160 : vector<4x1xf32> to vector<4x256xf32>
    %162 = arith.addf %159, %161 : vector<4x256xf32>
    %163 = vector.shape_cast %162 : vector<4x256xf32> to vector<1x4x256xf32>
    %c0_71 = arith.constant 0 : index
    %c0_72 = arith.constant 0 : index
    %c0_73 = arith.constant 0 : index
    %164 = vector.load %arg19[%c0_71, %c0_72, %c0_73] : memref<1x4x256xf32, #tpu.memory_space<vmem>>, vector<1x4x256xf32>
    tpu.vector_store %arg19[%c0_71, %c0_72, %c0_73], %163 {strides = array<i32>} : memref<1x4x256xf32, #tpu.memory_space<vmem>>, vector<1x4x256xf32>,
    return
  }
  func.func @transform_0(%arg0: i32, %arg1: i32) -> (i32, i32, i32, i32) {
    %c0_i32 = arith.constant 0 : i32
    %c0_i32_0 = arith.constant 0 : i32
    %c0_i32_1 = arith.constant 0 : i32
    return %arg0, %arg1, %c0_i32, %c0_i32_0 : i32, i32, i32, i32
  }
  func.func @transform_1(%arg0: i32, %arg1: i32) -> (i32, i32) {
    %c0_i32 = arith.constant 0 : i32
    %c0_i32_0 = arith.constant 0 : i32
    %c0_i32_1 = arith.constant 0 : i32
    return %c0_i32, %c0_i32_0 : i32, i32
  }
  func.func @transform_2(%arg0: i32, %arg1: i32) -> (i32, i32) {
    %c0_i32 = arith.constant 0 : i32
    %c0_i32_0 = arith.constant 0 : i32
    %c0_i32_1 = arith.constant 0 : i32
    return %c0_i32, %c0_i32_0 : i32, i32
  }
  func.func @transform_3(%arg0: i32, %arg1: i32) -> (i32, i32) {
    %c0_i32 = arith.constant 0 : i32
    %c0_i32_0 = arith.constant 0 : i32
    %c0_i32_1 = arith.constant 0 : i32
    return %c0_i32, %c0_i32_0 : i32, i32
  }
  func.func @transform_4(%arg0: i32, %arg1: i32) -> (i32, i32) {
    %c0_i32 = arith.constant 0 : i32
    %c0_i32_0 = arith.constant 0 : i32
    %c0_i32_1 = arith.constant 0 : i32
    return %c0_i32, %c0_i32_0 : i32, i32
  }
  func.func @transform_5(%arg0: i32, %arg1: i32) -> (i32, i32) {
    %c0_i32 = arith.constant 0 : i32
    %c0_i32_0 = arith.constant 0 : i32
    %c0_i32_1 = arith.constant 0 : i32
    return %c0_i32, %c0_i32_0 : i32, i32
  }
  func.func @transform_6(%arg0: i32, %arg1: i32) -> (i32, i32) {
    %c0_i32 = arith.constant 0 : i32
    %c0_i32_0 = arith.constant 0 : i32
    %c0_i32_1 = arith.constant 0 : i32
    return %c0_i32, %c0_i32_0 : i32, i32
  }
  func.func @transform_7(%arg0: i32, %arg1: i32) -> (i32, i32) {
    %c0_i32 = arith.constant 0 : i32
    %c0_i32_0 = arith.constant 0 : i32
    %c0_i32_1 = arith.constant 0 : i32
    return %c0_i32, %c0_i32_0 : i32, i32
  }
  func.func @transform_8(%arg0: i32, %arg1: i32) -> (i32, i32) {
    %c0_i32 = arith.constant 0 : i32
    %c0_i32_0 = arith.constant 0 : i32
    %c0_i32_1 = arith.constant 0 : i32
    return %c0_i32, %c0_i32_0 : i32, i32
  }
  func.func @transform_9(%arg0: i32, %arg1: i32) -> (i32, i32) {
    %c0_i32 = arith.constant 0 : i32
    %c0_i32_0 = arith.constant 0 : i32
    %c0_i32_1 = arith.constant 0 : i32
    return %c0_i32, %c0_i32_0 : i32, i32
  }
  func.func @transform_10(%arg0: i32, %arg1: i32) -> (i32, i32) {
    %c0_i32 = arith.constant 0 : i32
    %c0_i32_0 = arith.constant 0 : i32
    %c0_i32_1 = arith.constant 0 : i32
    return %c0_i32, %c0_i32_0 : i32, i32
  }
  func.func @transform_11(%arg0: i32, %arg1: i32) -> (i32, i32) {
    %c0_i32 = arith.constant 0 : i32
    %c0_i32_0 = arith.constant 0 : i32
    %c0_i32_1 = arith.constant 0 : i32
    return %c0_i32, %c0_i32_0 : i32, i32
  }
  func.func @transform_12(%arg0: i32, %arg1: i32) -> (i32, i32) {
    %c0_i32 = arith.constant 0 : i32
    %c0_i32_0 = arith.constant 0 : i32
    %c0_i32_1 = arith.constant 0 : i32
    return %c0_i32, %c0_i32_0 : i32, i32
  }
  func.func @transform_13(%arg0: i32, %arg1: i32) -> (i32, i32) {
    %c0_i32 = arith.constant 0 : i32
    %c0_i32_0 = arith.constant 0 : i32
    %c0_i32_1 = arith.constant 0 : i32
    return %c0_i32, %c0_i32_0 : i32, i32
  }
  func.func @transform_14(%arg0: i32, %arg1: i32) -> (i32, i32) {
    %c0_i32 = arith.constant 0 : i32
    %c0_i32_0 = arith.constant 0 : i32
    %c0_i32_1 = arith.constant 0 : i32
    return %c0_i32, %c0_i32_0 : i32, i32
  }
  func.func @transform_15(%arg0: i32, %arg1: i32) -> (i32, i32) {
    %c0_i32 = arith.constant 0 : i32
    %c0_i32_0 = arith.constant 0 : i32
    %c0_i32_1 = arith.constant 0 : i32
    return %c0_i32, %c0_i32_0 : i32, i32
  }
  func.func @transform_16(%arg0: i32, %arg1: i32) -> (i32, i32) {
    %c0_i32 = arith.constant 0 : i32
    %c0_i32_0 = arith.constant 0 : i32
    %c0_i32_1 = arith.constant 0 : i32
    return %c0_i32, %c0_i32_0 : i32, i32
  }
  func.func @transform_17(%arg0: i32, %arg1: i32) -> (i32, i32, i32) {
    %c0_i32 = arith.constant 0 : i32
    %c0_i32_0 = arith.constant 0 : i32
    return %arg0, %c0_i32, %arg1 : i32, i32, i32
  }
}

</mosaic_0001>

<bundles_post_ra>
// kernel: scarnet_forward.1
= control target key start
LH: loop header
LB: loop body
LE: loop exit
PB: predicated region body
PF: predicated region fallthrough
CT: control target
= control target key end

     0   :  { %s3949_s24 = smov 0   ;;  %s3951_s25 = smov 0   ;;  %s4730_s0 = inlined_call_operand.vmem [shape: f32[2,1,1,288], index: 0, kind: input, shape index: {}]   ;;  %s4731_s1 = inlined_call_operand.vmem [shape: f32[224,2], index: 1, kind: input, shape index: {}]   ;;  %s4732_s2 = inlined_call_operand.vmem [shape: f32[32,224], index: 2, kind: input, shape index: {}]   ;;  %s4733_s3 = inlined_call_operand.vmem [shape: f32[32,1], index: 3, kind: input, shape index: {}]   ;;  %s4734_s4 = inlined_call_operand.vmem [shape: f32[32,32], index: 4, kind: input, shape index: {}]   ;;  %s4735_s5 = inlined_call_operand.vmem [shape: f32[32,1], index: 5, kind: input, shape index: {}]   ;;  %s4736_s6 = inlined_call_operand.vmem [shape: f32[4,32], index: 6, kind: input, shape index: {}]   ;;  %s4737_s7 = inlined_call_operand.vmem [shape: f32[4,1], index: 7, kind: input, shape index: {}]   ;;  %s4738_s8 = inlined_call_operand.vmem [shape: f32[16,2], index: 8, kind: input, shape index: {}]   ;;  %s4739_s9 = inlined_call_operand.vmem [shape: f32[4,16], index: 9, kind: input, shape index: {}]   ;;  %s4740_s10 = inlined_call_operand.vmem [shape: f32[4,1], index: 10, kind: input, shape index: {}]   ;;  %s4741_s11 = inlined_call_operand.vmem [shape: f32[8,72], index: 11, kind: input, shape index: {}]   ;;  %s4742_s12 = inlined_call_operand.vmem [shape: f32[8,1], index: 12, kind: input, shape index: {}]   ;;  %s4743_s13 = inlined_call_operand.vmem [shape: f32[8,1], index: 13, kind: input, shape index: {}]   ;;  %s4744_s14 = inlined_call_operand.vmem [shape: f32[8,1], index: 14, kind: input, shape index: {}]   ;;  %s4745_s15 = inlined_call_operand.vmem [shape: f32[4,8], index: 15, kind: input, shape index: {}]   ;;  %s4746_s16 = inlined_call_operand.vmem [shape: f32[4,1], index: 16, kind: input, shape index: {}]   ;;  %s4747_s17 = inlined_call_operand.vmem [shape: f32[2,4,256], index: 17, kind: output, shape index: {}]  }
   0x1   :  { %4749 = sst [smem:[#allocation2_spill]] %s4730_s0  ;;  %s3953_s26 = smov 0  }
   0x2   :  { %4750 = sst [smem:[#allocation3_spill]] %s4731_s1 }
   0x3 LB: > { %s39_s27 = sadd.s32 1, %s3839_s25  ;;  %p3466_p0 = scmp.ge.s32.totalorder %s3843_s26, 1  ;;  %s3843_s26 = sphi %s3953_s26, %s27_s26   ;;  %s3839_s25 = sphi %s3951_s25, %s4758_s25   ;;  %s3835_s24 = sphi %s3949_s24, %s4757_s24  }
   0x4   : > { %p41_p1 = scmp.ge.s32.totalorder %s39_s27, 2  ;;  %p506_p2 = scmp.lt.s32.totalorder %s3843_s26, 3 }
   0x6   : > { %s4760_s27 = smov (%p41_p1, %s39_s27), 0  ;;  %p507_p3 = pnand %p3466_p0, %p506_p2 }
   0x7   : > { %p565_p4 = scmp.lt.s32.totalorder (!%p507_p3), %s3835_s24, 1  ;;  %s4751_s0 = sld [smem:[#allocation3_spill]] (!%p507_p3) }
   0x8   : > { %510 = sbr.rel (%p507_p3) target bundleno = 2217 (0x8a9), region = 88  ;;  %s4752_s1 = sld [smem:[#allocation2_spill]] (!%p507_p3) }
   0x9   : > { %s3848_s18 = smov (!%p507_p3), 32   ;;  %s3849_s19 = smov (!%p507_p3), 97  }
   0xa   : > { %s3851_s22 = smov (!%p507_p3), 120   ;;  %s3852_s23 = smov (!%p507_p3), 112  }
   0xb   : > { %s3853_s28 = smov (!%p507_p3), 104   ;;  %s3854_s29 = smov (!%p507_p3), 96  }
   0xd   : > { %v585_v0 = vlaneseq  ;;  %v3845_v1 = vmov 0.0   ;;  %v604_v2 = vld [vmem:[%s4751_s0] sm:$0xff]  ;;  %vm632_vm0 = vcmask 15360   ;;  %s4762_s24 = smov (!%p565_p4, %s3835_s24), 1  ;;  %vm600_vm1 = vcmask 1040384   ;;  %v605_v14 = vld [vmem:[%s4751_s0 + $0x8] sm:$0xff] }
   0xe   : > { %791 = vmatprep.mubr.f32.mxu0 %v3845_v1  ;;  %3635 = vmatprep.mubr.msk.f32.mxu1 %vm632_vm0, %v604_v2  ;;  %s3714_s30 = smul.u32 3, %s4762_s24  ;;  %vm717_vm2 = vcmask 1041408   ;;  %v606_v15 = vld [vmem:[%s4751_s0 + $0x10] sm:$0xff]  ;;  %v607_v16 = vld [vmem:[%s4751_s0 + $0x18] sm:$0xff]  ;;  %v608_v17 = vld [vmem:[%s4751_s0 + $0x20] sm:$0xff]  ;;  %vm1281_vm3 = vcmask 785408  }
   0xf   : > { %v586_v3 = vshrl.u32 %v585_v0, 7  ;;  %v610_v18 = vld [vmem:[%s4751_s0 + $0x30] sm:$0xff]  ;;  %v609_v19 = vld [vmem:[%s4751_s0 + $0x28] sm:$0xff]  ;;  %v611_v20 = vld [vmem:[%s4751_s0 + $0x38] sm:$0xff]  ;;  %vm1496_vm4 = vcmask 261120   ;;  %vm3847_vm5 = vmmov 0  }
  0x10   : > { %s572_s20 = scalar_lea.vmem %s4752_s1, %s3714_s30  ;;  %v612_v21 = vld [vmem:[%s4751_s0 + $0x40] sm:$0xff]  ;;  %v613_v22 = vld [vmem:[%s4751_s0 + $0x48] sm:$0xff]  ;;  %v614_v23 = vld [vmem:[%s4751_s0 + $0x50] sm:$0xff]  ;;  %vm2091_vm6 = vcmask 130048   ;;  %vm2236_vm7 = vcmask 1043456   ;;  %vm2251_vm8 = vcmask 257024  }
  0x11   : > { %v591_v4 = vsub.s32 1, %v586_v3  ;;  %v595_v5 = vsub.s32 2, %v586_v3  ;;  %v587_v6 = vsub.s32 0, %v586_v3  ;;  %v583_v7 = vld [vmem:[%s572_s20] sm:$0x7]  ;;  %v615_v24 = vld [vmem:[%s4751_s0 + $0x58] sm:$0xff] }
  0x12   : > { %v616_v25 = vld [vmem:[%s4751_s0 + $0x60] sm:$0xff]  ;;  %v617_v26 = vld [vmem:[%s4751_s0 + $0x68] sm:$0xff]  ;;  %v618_v27 = vld [vmem:[%s4751_s0 + $0x70] sm:$0xff]  ;;  %vm2445_vm11 = vcmask 1047808   ;;  %s3850_s1 = smov 127   ;;  %vm2509_vm12 = vcmask 64512  }
  0x13   : > { %v592_v8 = vrot.slane %v583_v7, %v591_v4  ;;  %v596_v9 = vrot.slane %v583_v7, %v595_v5  ;;  %v588_v10 = vrot.slane %v583_v7, %v587_v6  ;;  %v619_v28 = vld [vmem:[%s4751_s0 + $0x78] sm:$0xff]  ;;  %v620_v29 = vld [vmem:[%s4751_s0 + $0x80] sm:$0xff]  ;;  %v622_v30 = vld [vmem:[%s4751_s0 + $0x90] sm:$0xff]  ;;  %v3846_v6 = vmov 0   ;;  %s3855_s30 = smov 88   ;;  %s3584_s20 = sshll.u32 %s4762_s24, 3 }
  0x14   : > { %v621_v31 = vld [vmem:[%s4751_s0 + $0x88] sm:$0xff]  ;;  %v623_v32 = vld [vmem:[%s4751_s0 + $0x98] sm:$0xff]  ;;  %v624_v33 = vld [vmem:[%s4751_s0 + $0xa0] sm:$0xff]  ;;  %3754 = vset.pattern.permute.xlu1 %v3846_v6  ;;  %3753 = vset.pattern.permute.xlu0 %v3846_v6  ;;  %vm2470_vm13 = vcmask 793600  }
  0x15   : > { %v3979_v11 = vsel %vm600_vm1, %v592_v8, 1.0  ;;  %v3981_v12 = vsel %vm600_vm1, %v596_v9, 1.0  ;;  %v3983_v13 = vsel %vm600_vm1, %v588_v10, 1.0  ;;  %v625_v34 = vld [vmem:[%s4751_s0 + $0xa8] sm:$0xff]  ;;  %v626_v35 = vld [vmem:[%s4751_s0 + $0xb0] sm:$0xff]  ;;  %v627_v36 = vld [vmem:[%s4751_s0 + $0xb8] sm:$0xff] }
  0x16   : > { %3469 = vmatprep.subr.msk.mxu0 %vm717_vm2, %v3979_v11  ;;  %3633 = vmatprep.subr.msk.mxu1 %vm717_vm2, %v3981_v12  ;;  %v628_v37 = vld [vmem:[%s4751_s0 + $0xc0] sm:$0xff]  ;;  %v629_v38 = vld [vmem:[%s4751_s0 + $0xc8] sm:$0xff]  ;;  %v630_v39 = vld [vmem:[%s4751_s0 + $0xd0] sm:$0xff] }
  0x17   : > { %3470 = vmatpush1.msk.msra.mxu0 %vm717_vm2, %v3983_v13  ;;  %3634 = vmatpush3.msk.msra.mxu1 %vm717_vm2, %v3981_v12  ;;  %v631_v40 = vld [vmem:[%s4751_s0 + $0xd8] sm:$0xff]  ;;  %v1250_v49 = vld [vmem:[%s4732_s2 + $0x8] sm:$0xff]  ;;  %v1257_v9 = vld [vmem:[%s4733_s3] sm:$0xff] }
  0x18   : > { %3471 = vmatmul.mubr.msk.f32.vlgmr.msra.gmra.mxu0 %vm632_vm0, %v604_v2  ;;  %3636 = vmatmul.mubr.msk.f32.vlgmr.msra.gmra.mxu1 %vm632_vm0, %v605_v14  ;;  %v1258_v2 = vld [vmem:[%s4733_s3 + $0x8] sm:$0xff]  ;;  %v1260_v3 = vld [vmem:[%s4733_s3 + $0x18] sm:$0xff]  ;;  %v1259_v10 = vld [vmem:[%s4733_s3 + $0x10] sm:$0xff] }
  0x19   : > { %797 = vmatprep.mubr.f32.mxu0 %v3845_v1  ;;  %3638 = vmatprep.mubr.msk.f32.mxu1 %vm632_vm0, %v606_v15 }
  0x1a   : > { %1383 = vmatprep.subr.mxu0 %v3845_v1  ;;  %1268 = vperm.xlu1 %3754, %v1258_v2  }
  0x1b   : > { %1278 = vperm.xlu0 %3753, %v1260_v3  }
  0x1c   : > { %3472 = vmatmul.mubr.msk.f32.gmra.mxu0 %vm632_vm0, %v605_v14  ;;  %3639 = vmatmul.mubr.msk.f32.gmra.mxu1 %vm632_vm0, %v607_v16 }
  0x1d   : > { %803 = vmatprep.mubr.f32.mxu0 %v3845_v1  ;;  %3641 = vmatprep.mubr.msk.f32.mxu1 %vm632_vm0, %v608_v17 }
  0x1e   : > { %1263 = vperm.xlu1 %3754, %v1257_v9  }
  0x1f   : > { %1273 = vperm.xlu0 %3753, %v1259_v10  }
  0x20   : > { %3473 = vmatmul.mubr.msk.f32.gmra.mxu0 %vm632_vm0, %v606_v15  ;;  %3642 = vmatmul.mubr.msk.f32.gmra.mxu1 %vm632_vm0, %v609_v19 }
  0x21   : > { %809 = vmatprep.mubr.f32.mxu0 %v3845_v1  ;;  %3644 = vmatprep.mubr.msk.f32.mxu1 %vm632_vm0, %v610_v18 }
  0x24   : > { %3474 = vmatmul.mubr.msk.f32.gmra.mxu0 %vm632_vm0, %v607_v16  ;;  %3645 = vmatmul.mubr.msk.f32.gmra.mxu1 %vm632_vm0, %v611_v20 }
  0x25   : > { %815 = vmatprep.mubr.f32.mxu0 %v3845_v1  ;;  %3647 = vmatprep.mubr.msk.f32.mxu1 %vm632_vm0, %v612_v21 }
  0x28   : > { %3475 = vmatmul.mubr.msk.f32.gmra.mxu0 %vm632_vm0, %v608_v17  ;;  %3648 = vmatmul.mubr.msk.f32.gmra.mxu1 %vm632_vm0, %v613_v22 }
  0x29   : > { %821 = vmatprep.mubr.f32.mxu0 %v3845_v1  ;;  %3650 = vmatprep.mubr.msk.f32.mxu1 %vm632_vm0, %v614_v23 }
  0x2c   : > { %3476 = vmatmul.mubr.msk.f32.gmra.mxu0 %vm632_vm0, %v609_v19  ;;  %3651 = vmatmul.mubr.msk.f32.gmra.mxu1 %vm632_vm0, %v615_v24 }
  0x2d   : > { %827 = vmatprep.mubr.f32.mxu0 %v3845_v1  ;;  %3653 = vmatprep.mubr.msk.f32.mxu1 %vm632_vm0, %v616_v25 }
  0x30   : > { %3477 = vmatmul.mubr.msk.f32.gmra.mxu0 %vm632_vm0, %v610_v18  ;;  %3654 = vmatmul.mubr.msk.f32.gmra.mxu1 %vm632_vm0, %v617_v26  ;;  %v1475_v18 = vld [vmem:[%s4735_s5 + $0x18] sm:$0xff] }
  0x31   : > { %833 = vmatprep.mubr.f32.mxu0 %v3845_v1  ;;  %3656 = vmatprep.mubr.msk.f32.mxu1 %vm632_vm0, %v618_v27 }
  0x32   : > { %1493 = vperm.xlu0 %3753, %v1475_v18  }
  0x34   : > { %3478 = vmatmul.mubr.msk.f32.gmra.mxu0 %vm632_vm0, %v611_v20  ;;  %3657 = vmatmul.mubr.msk.f32.gmra.mxu1 %vm632_vm0, %v619_v28  ;;  %v1474_v20 = vld [vmem:[%s4735_s5 + $0x10] sm:$0xff] }
  0x35   : > { %839 = vmatprep.mubr.f32.mxu0 %v3845_v1  ;;  %3659 = vmatprep.mubr.msk.f32.mxu1 %vm632_vm0, %v620_v29 }
  0x36   : > { %1488 = vperm.xlu1 %3754, %v1474_v20  }
  0x38   : > { %3479 = vmatmul.mubr.msk.f32.gmra.mxu0 %vm632_vm0, %v612_v21  ;;  %3660 = vmatmul.mubr.msk.f32.gmra.mxu1 %vm632_vm0, %v621_v31 }
  0x39   : > { %845 = vmatprep.mubr.f32.mxu0 %v3845_v1  ;;  %3662 = vmatprep.mubr.msk.f32.mxu1 %vm632_vm0, %v622_v30 }
  0x3c   : > { %3480 = vmatmul.mubr.msk.f32.gmra.mxu0 %vm632_vm0, %v613_v22  ;;  %3663 = vmatmul.mubr.msk.f32.gmra.mxu1 %vm632_vm0, %v623_v32 }
  0x3d   : > { %851 = vmatprep.mubr.f32.mxu0 %v3845_v1  ;;  %3665 = vmatprep.mubr.msk.f32.mxu1 %vm632_vm0, %v624_v33 }
  0x40   : > { %3481 = vmatmul.mubr.msk.f32.gmra.mxu0 %vm632_vm0, %v614_v23  ;;  %3666 = vmatmul.mubr.msk.f32.gmra.mxu1 %vm632_vm0, %v625_v34 }
  0x41   : > { %857 = vmatprep.mubr.f32.mxu0 %v3845_v1  ;;  %3668 = vmatprep.mubr.msk.f32.mxu1 %vm632_vm0, %v626_v35 }
  0x44   : > { %3482 = vmatmul.mubr.msk.f32.gmra.mxu0 %vm632_vm0, %v615_v24  ;;  %3669 = vmatmul.mubr.msk.f32.gmra.mxu1 %vm632_vm0, %v627_v36 }
  0x45   : > { %863 = vmatprep.mubr.f32.mxu0 %v3845_v1  ;;  %3671 = vmatprep.mubr.msk.f32.mxu1 %vm632_vm0, %v628_v37 }
  0x48   : > { %3483 = vmatmul.mubr.msk.f32.gmra.mxu0 %vm632_vm0, %v616_v25  ;;  %3672 = vmatmul.mubr.msk.f32.gmra.mxu1 %vm632_vm0, %v629_v38 }
  0x49   : > { %869 = vmatprep.mubr.f32.mxu0 %v3845_v1  ;;  %3674 = vmatprep.mubr.msk.f32.mxu1 %vm632_vm0, %v630_v39 }
  0x4c   : > { %3484 = vmatmul.mubr.msk.f32.gmra.mxu0 %vm632_vm0, %v617_v26  ;;  %3675 = vmatmul.mubr.msk.f32.gmra.mxu1 %vm632_vm0, %v631_v40 }
  0x4d   : > { %875 = vmatprep.mubr.f32.mxu0 %v3845_v1  ;;  %3528 = vmatprep.mubr.msk.f32.mxu1 %vm1281_vm3, %v1250_v49 }
  0x50   : > { %3485 = vmatmul.mubr.msk.f32.gmra.mxu0 %vm632_vm0, %v618_v27  ;;  %v1473_v27 = vld [vmem:[%s4735_s5 + $0x8] sm:$0xff] }
  0x51   : > { %881 = vmatprep.mubr.f32.mxu0 %v3845_v1  ;;  %1483 = vperm.xlu0 %3753, %v1473_v27  }
  0x54   : > { %3486 = vmatmul.mubr.msk.f32.gmra.mxu0 %vm632_vm0, %v619_v28 }
  0x55   : > { %887 = vmatprep.mubr.f32.mxu0 %v3845_v1 }
  0x58   : > { %3487 = vmatmul.mubr.msk.f32.gmra.mxu0 %vm632_vm0, %v620_v29  ;;  %v1472_v29 = vld [vmem:[%s4735_s5] sm:$0xff] }
  0x59   : > { %893 = vmatprep.mubr.f32.mxu0 %v3845_v1  ;;  %1478 = vperm.xlu1 %3754, %v1472_v29  }
  0x5c   : > { %3488 = vmatmul.mubr.msk.f32.gmra.mxu0 %vm632_vm0, %v621_v31 }
  0x5d   : > { %899 = vmatprep.mubr.f32.mxu0 %v3845_v1 }
  0x60   : > { %3489 = vmatmul.mubr.msk.f32.gmra.mxu0 %vm632_vm0, %v622_v30 }
  0x61   : > { %905 = vmatprep.mubr.f32.mxu0 %v3845_v1 }
  0x64   : > { %3490 = vmatmul.mubr.msk.f32.gmra.mxu0 %vm632_vm0, %v623_v32 }
  0x65   : > { %911 = vmatprep.mubr.f32.mxu0 %v3845_v1 }
  0x68   : > { %3491 = vmatmul.mubr.msk.f32.gmra.mxu0 %vm632_vm0, %v624_v33 }
  0x69   : > { %917 = vmatprep.mubr.f32.mxu0 %v3845_v1 }
  0x6c   : > { %3492 = vmatmul.mubr.msk.f32.gmra.mxu0 %vm632_vm0, %v625_v34 }
  0x6d   : > { %923 = vmatprep.mubr.f32.mxu0 %v3845_v1 }
  0x70   : > { %3493 = vmatmul.mubr.msk.f32.gmra.mxu0 %vm632_vm0, %v626_v35  ;;  %v2085_v35 = vld [vmem:[%s4740_s10] sm:$0xf] }
  0x71   : > { %929 = vmatprep.mubr.f32.mxu0 %v3845_v1  ;;  %2088 = vperm.xlu0 %3753, %v2085_v35  }
  0x74   : > { %3494 = vmatmul.mubr.msk.f32.gmra.mxu0 %vm632_vm0, %v627_v36 }
  0x75   : > { %935 = vmatprep.mubr.f32.mxu0 %v3845_v1 }
  0x78   : > { %3495 = vmatmul.mubr.msk.f32.gmra.mxu0 %vm632_vm0, %v628_v37  ;;  %v1768_v37 = vld [vmem:[%s4737_s7] sm:$0xf] }
  0x79   : > { %941 = vmatprep.mubr.f32.mxu0 %v3845_v1  ;;  %1771 = vperm.xlu1 %3754, %v1768_v37  }
  0x7c   : > { %3496 = vmatmul.mubr.msk.f32.gmra.mxu0 %vm632_vm0, %v629_v38 }
  0x7d   : > { %947 = vmatprep.mubr.f32.mxu0 %v3845_v1 }
  0x80   : > { %3497 = vmatmul.mubr.msk.f32.gmra.mxu0 %vm632_vm0, %v630_v39 }
  0x81   : > { %953 = vmatprep.mubr.f32.mxu0 %v3845_v1 }
  0x84   : > { %3498 = vmatmul.mubr.msk.f32.gmra.mxu0 %vm632_vm0, %v631_v40 }
  0x85   : > { %3532 = vmatprep.mubr.msk.f32.mxu0 %vm1281_vm3, %v1250_v49 }
  0xd8   : > { %v4157_v41 = vpop.f32.mrf.mxu0  ;;  %v4159_v42 = vpop.f32.mrf.mxu1 }
  0xda   : > { %v4161_v43 = vpop.f32.mrf.mxu0  ;;  %v4163_v44 = vpop.f32.mrf.mxu1 }
  0xdc   : > { %v4165_v45 = vpop.f32.mrf.mxu0  ;;  %v4167_v46 = vpop.f32.mrf.mxu1 }
  0xdd   : > { %v1176_v20 = vmax.f32 %v4167_v46, 0.0 }
  0xde   : > { %v4169_v47 = vpop.f32.mrf.mxu0  ;;  %v4171_v48 = vpop.f32.mrf.mxu1 }
  0xe0   : > { %v4176_v50 = vpop.f32.mrf.mxu0  ;;  %v4178_v51 = vpop.f32.mrf.mxu1 }
  0xe2   : > { %v4182_v52 = vpop.f32.mrf.mxu0  ;;  %v4184_v53 = vpop.f32.mrf.mxu1 }
  0xe3   : > { %v1179_v18 = vmax.f32 %v4184_v53, 0.0  ;;  %v1170_v53 = vmax.f32 %v4159_v42, 0.0 }
  0xe4   : > { %v4186_v54 = vpop.f32.mrf.mxu0  ;;  %v4188_v55 = vpop.f32.mrf.mxu1 }
  0xe6   : > { %v4190_v56 = vpop.f32.mrf.mxu0  ;;  %v4192_v57 = vpop.f32.mrf.mxu1 }
  0xe7   : > { %v1185_v9 = vmax.f32 %v4192_v57, 0.0 }
  0xe8   : > { %v4194_v58 = vpop.f32.mrf.mxu0  ;;  %v4196_v59 = vpop.f32.mrf.mxu1 }
  0xe9   : > { %v1194_v40 = vmax.f32 %v4196_v59, 0.0  ;;  %v1188_v59 = vmax.f32 %v4188_v55, 0.0 }
  0xea   : > { %v4198_v60 = vpop.f32.mrf.mxu0  ;;  %v4200_v61 = vpop.f32.mrf.mxu1 }
  0xeb   : > { %v1191_v2 = vmax.f32 %v4200_v61, 0.0 }
  0xec   : > { %v4202_v62 = vpop.f32.mrf.mxu0  ;;  %v3652_v63 = vpop.f32.mrf.mxu1 }
  0xed   : > { %v1200_v32 = vmax.f32 %v3652_v63, 0.0 }
  0xee   : > { %v4210_v4 = vpop.f32.mrf.mxu0  ;;  %v1076_v5 = vpop.f32.mrf.mxu1 }
  0xef   : > { %v1197_v36 = vmax.f32 %v1076_v5, 0.0 }
  0xf0   : > { %v4212_v7 = vpop.f32.mrf.mxu0  ;;  %v3655_v8 = vpop.f32.mrf.mxu1 }
  0xf1   : > { %v1206_v23 = vmax.f32 %v3655_v8, 0.0 }
  0xf2   : > { %v4220_v14 = vpop.f32.mrf.mxu0  ;;  %v1086_v15 = vpop.f32.mrf.mxu1 }
  0xf3   : > { %v1203_v28 = vmax.f32 %v1086_v15, 0.0  ;;  %v1182_v15 = vmax.f32 %v4178_v51, 0.0  ;;  %v1173_v51 = vmax.f32 %v4171_v48, 0.0 }
  0xf4   : > { %v4222_v16 = vpop.f32.mrf.mxu0  ;;  %v3658_v17 = vpop.f32.mrf.mxu1 }
  0xf5   : > { %v1212_v19 = vmax.f32 %v3658_v17, 0.0 }
  0xf6   : > { %v4230_v21 = vpop.f32.mrf.mxu0  ;;  %v1096_v22 = vpop.f32.mrf.mxu1 }
  0xf7   : > { %v1209_v24 = vmax.f32 %v1096_v22, 0.0  ;;  %1384 = vmatpush1.msra.mxu0 %v1212_v19 }
  0xf8   : > { %v4232_v25 = vpop.f32.mrf.mxu0  ;;  %1385 = vmatprep.subr.mxu0 %v3845_v1  ;;  %v4235_v26 = vpop.f32.mrf.mxu1 }
  0xf9   : > { %1386 = vmatpush1.msra.mxu0 %v1209_v24 }
  0xfa   : > { %v4243_v30 = vpop.f32.mrf.mxu0  ;;  %1387 = vmatprep.subr.mxu0 %v3845_v1  ;;  %v4246_v31 = vpop.f32.mrf.mxu1 }
  0xfb   : > { %1388 = vmatpush1.msra.mxu0 %v1206_v23 }
  0xfc   : > { %v4248_v33 = vpop.f32.mrf.mxu0  ;;  %1389 = vmatprep.subr.mxu0 %v3845_v1  ;;  %v4251_v34 = vpop.f32.mrf.mxu1 }
  0xfd   : > { %1390 = vmatpush1.msra.mxu0 %v1203_v28  ;;  %v1167_v28 = vmax.f32 %v4163_v44, 0.0 }
  0xfe   : > { %v4259_v38 = vpop.f32.mrf.mxu0  ;;  %1391 = vmatprep.subr.mxu0 %v3845_v1  ;;  %v4262_v39 = vpop.f32.mrf.mxu1 }
  0xff   : > { %1392 = vmatpush1.msra.mxu0 %v1200_v32 }
 0x100   : > { %v4265_v49 = vpop.f32.mrf.mxu0  ;;  %1393 = vmatprep.subr.mxu0 %v3845_v1  ;;  %v4268_v63 = vpop.f32.mrf.mxu1 }
 0x101   : > { %1394 = vmatpush1.msra.mxu0 %v1197_v36 }
 0x102   : > { %v4271_v3 = vpop.f32.mrf.mxu0  ;;  %1395 = vmatprep.subr.mxu0 %v3845_v1  ;;  %v4274_v5 = vpop.f32.mrf.mxu1 }
 0x103   : > { %1396 = vmatpush1.msra.mxu0 %v1194_v40 }
 0x104   : > { %v4277_v6 = vpop.f32.mrf.mxu0  ;;  %1397 = vmatprep.subr.mxu0 %v3845_v1  ;;  %v4280_v8 = vpop.f32.mrf.mxu1 }
 0x105   : > { %1398 = vmatpush1.msra.mxu0 %v1191_v2 }
 0x106   : > { %v4283_v61 = vpop.f32.mrf.mxu0  ;;  %1399 = vmatprep.subr.mxu0 %v3845_v1  ;;  %v4286_v10 = vpop.f32.mrf.mxu1 }
 0x107   : > { %1400 = vmatpush1.msra.mxu0 %v1188_v59 }
 0x108   : > { %v4289_v55 = vpop.f32.mrf.mxu0  ;;  %1401 = vmatprep.subr.mxu0 %v3845_v1  ;;  %v3673_v17 = vpop.f32.mrf.mxu1 }
 0x109   : > { %1402 = vmatpush1.msra.mxu0 %v1185_v9  ;;  %v1242_v37 = vmax.f32 %v3673_v17, 0.0 }
 0x10a   : > { %v867_v19 = vpop.f32.mrf.mxu0  ;;  %1403 = vmatprep.subr.mxu0 %v3845_v1  ;;  %v1146_v57 = vpop.f32.mrf.mxu1 }
 0x10b   : > { %1404 = vmatpush1.msra.mxu0 %v1182_v15  ;;  %v1239_v59 = vmax.f32 %v1146_v57, 0.0  ;;  %v1233_v57 = vmax.f32 %v4286_v10, 0.0  ;;  %v1196_v10 = vmax.f32 %v4271_v3, 0.0 }
 0x10c   : > { %v871_v22 = vpop.f32.mrf.mxu0  ;;  %1405 = vmatprep.subr.mxu0 %v3845_v1  ;;  %v3676_v24 = vpop.f32.mrf.mxu1 }
 0x10d   : > { %1406 = vmatpush1.msra.mxu0 %v1179_v18  ;;  %v1248_v48 = vmax.f32 %v3676_v24, 0.0  ;;  %v1204_v17 = vmax.f32 %v871_v22, 0.0  ;;  %v1202_v24 = vmax.f32 %v867_v19, 0.0  ;;  %v1230_v22 = vmax.f32 %v4268_v63, 0.0 }
 0x10e   : > { %v873_v23 = vpop.f32.mrf.mxu0  ;;  %1407 = vmatprep.subr.mxu0 %v3845_v1  ;;  %v1156_v29 = vpop.f32.mrf.mxu1  ;;  %v1193_v63 = vmax.f32 %v4259_v38, 0.0 }
 0x10f   : > { %1408 = vmatpush1.msra.mxu0 %v1176_v20  ;;  %v1245_v35 = vmax.f32 %v1156_v29, 0.0  ;;  %v1205_v18 = vmax.f32 %v873_v23, 0.0  ;;  %v1236_v20 = vmax.f32 %v4280_v8, 0.0  ;;  %v1199_v8 = vmax.f32 %v4283_v61, 0.0 }
 0x110   : > { %v877_v27 = vpop.f32.mrf.mxu0  ;;  %1409 = vmatprep.subr.mxu0 %v3845_v1  ;;  %v1198_v23 = vmax.f32 %v4277_v6, 0.0  ;;  %v1224_v6 = vmax.f32 %v4251_v34, 0.0  ;;  %v1189_v29 = vmax.f32 %v4232_v25, 0.0  ;;  %v1218_v34 = vmax.f32 %v4235_v26, 0.0  ;;  %v4359_v26 = vld [vmem:[%s4732_s2] sm:$0xff] }
 0x111   : > { %1410 = vmatpush1.msra.mxu0 %v1173_v51  ;;  %v1207_v9 = vmax.f32 %v877_v27, 0.0  ;;  %v1184_v25 = vmax.f32 %v4220_v14, 0.0  ;;  %v1180_v14 = vmax.f32 %v4202_v62, 0.0  ;;  %v1175_v62 = vmax.f32 %v4190_v56, 0.0 }
 0x112   : > { %v879_v46 = vpop.f32.mrf.mxu0  ;;  %1411 = vmatprep.subr.mxu0 %v3845_v1  ;;  %v1172_v56 = vmax.f32 %v4182_v52, 0.0  ;;  %v1168_v52 = vmax.f32 %v4165_v45, 0.0  ;;  %v4412_v45 = vld [vmem:[%s4732_s2 + $0x30] sm:$0xff] }
 0x113   : > { %1412 = vmatpush1.msra.mxu0 %v1170_v53  ;;  %v1208_v2 = vmax.f32 %v879_v46, 0.0  ;;  %v1201_v53 = vmax.f32 %v4289_v55, 0.0  ;;  %v1227_v55 = vmax.f32 %v4274_v5, 0.0  ;;  %v1192_v46 = vmax.f32 %v4248_v33, 0.0 }
 0x114   : > { %v883_v32 = vpop.f32.mrf.mxu0  ;;  %1413 = vmatprep.subr.mxu0 %v3845_v1  ;;  %v1221_v5 = vmax.f32 %v4262_v39, 0.0  ;;  %v1187_v33 = vmax.f32 %v4230_v21, 0.0  ;;  %v1215_v39 = vmax.f32 %v4246_v31, 0.0 }
 0x115   : > { %1414 = vmatpush1.msra.mxu0 %v1167_v28  ;;  %v1210_v40 = vmax.f32 %v883_v32, 0.0  ;;  %v1195_v28 = vmax.f32 %v4265_v49, 0.0  ;;  %v1190_v49 = vmax.f32 %v4243_v30, 0.0  ;;  %v1183_v32 = vmax.f32 %v4212_v7, 0.0  ;;  %v4368_v7 = vld [vmem:[%s4732_s2 + $0x18] sm:$0xff] }
 0x116   : > { %v885_v36 = vpop.f32.mrf.mxu0  ;;  %1423 = vmatprep.subr.mxu0 %v3845_v1 }
 0x117   : > { %v1211_v42 = vmax.f32 %v885_v36, 0.0  ;;  %1424 = vmatpush2.msra.mxu0 %v1248_v48  ;;  %v1186_v48 = vmax.f32 %v4222_v16, 0.0  ;;  %v1181_v16 = vmax.f32 %v4210_v4, 0.0  ;;  %v1178_v4 = vmax.f32 %v4198_v60, 0.0 }
 0x118   : > { %v4304_v44 = vpop.f32.mrf.mxu0  ;;  %1425 = vmatprep.subr.mxu0 %v3845_v1  ;;  %v1174_v60 = vmax.f32 %v4186_v54, 0.0  ;;  %v4396_v54 = vld [vmem:[%s4732_s2 + $0x20] sm:$0xff] }
 0x119   : > { %1294 = vmatprep.subr.mxu1 %v1211_v42  ;;  %1426 = vmatpush2.msra.mxu0 %v1245_v35  ;;  %v1177_v35 = vmax.f32 %v4194_v58, 0.0  ;;  %v4379_v42 = vld [vmem:[%s4732_s2 + $0x10] sm:$0xff]  ;;  %v4387_v58 = vld [vmem:[%s4732_s2 + $0x28] sm:$0xff] }
 0x11a   : > { %v4307_v15 = vpop.f32.mrf.mxu0  ;;  %1295 = vmatpush1.msra.mxu1 %v1210_v40  ;;  %1427 = vmatprep.subr.mxu0 %v3845_v1  ;;  %v1171_v40 = vmax.f32 %v4176_v50, 0.0  ;;  %v4404_v50 = vld [vmem:[%s4732_s2 + $0x38] sm:$0xff] }
 0x11b   : > { %1296 = vmatprep.subr.mxu1 %v1208_v2  ;;  %1428 = vmatpush2.msra.mxu0 %v1242_v37 }
 0x11c   : > { %v4311_v51 = vpop.f32.mrf.mxu0  ;;  %1297 = vmatpush1.msra.mxu1 %v1207_v9  ;;  %1429 = vmatprep.subr.mxu0 %v3845_v1 }
 0x11d   : > { %1298 = vmatprep.subr.mxu1 %v1205_v18  ;;  %1430 = vmatpush2.msra.mxu0 %v1239_v59  ;;  %v1169_v59 = vmax.f32 %v4169_v47, 0.0  ;;  %v1166_v47 = vmax.f32 %v4161_v43, 0.0  ;;  %v1165_v18 = vmax.f32 %v4157_v41, 0.0 }
 0x11e   : > { %v4316_v27 = vpop.f32.mrf.mxu0  ;;  %1299 = vmatpush1.msra.mxu1 %v1204_v17  ;;  %1431 = vmatprep.subr.mxu0 %v3845_v1 }
 0x11f   : > { %1300 = vmatprep.subr.mxu1 %v1202_v24  ;;  %1432 = vmatpush2.msra.mxu0 %v1236_v20 }
 0x120   : > { %v4322_v19 = vpop.f32.mrf.mxu0  ;;  %1301 = vmatpush1.msra.mxu1 %v1201_v53  ;;  %1433 = vmatprep.subr.mxu0 %v3845_v1 }
 0x121   : > { %1302 = vmatprep.subr.mxu1 %v1199_v8  ;;  %1434 = vmatpush2.msra.mxu0 %v1233_v57 }
 0x122   : > { %v4328_v61 = vpop.f32.mrf.mxu0  ;;  %1303 = vmatpush1.msra.mxu1 %v1198_v23  ;;  %1435 = vmatprep.subr.mxu0 %v3845_v1 }
 0x123   : > { %1304 = vmatprep.subr.mxu1 %v1196_v10  ;;  %1436 = vmatpush2.msra.mxu0 %v1230_v22 }
 0x124   : > { %v4334_v3 = vpop.f32.mrf.mxu0  ;;  %1305 = vmatpush1.msra.mxu1 %v1195_v28  ;;  %1437 = vmatprep.subr.mxu0 %v3845_v1 }
 0x125   : > { %1306 = vmatprep.subr.mxu1 %v1193_v63  ;;  %1438 = vmatpush2.msra.mxu0 %v1227_v55 }
 0x126   : > { %v4340_v38 = vpop.f32.mrf.mxu0  ;;  %1307 = vmatpush1.msra.mxu1 %v1192_v46  ;;  %1439 = vmatprep.subr.mxu0 %v3845_v1 }
 0x127   : > { %1308 = vmatprep.subr.mxu1 %v1190_v49  ;;  %1440 = vmatpush2.msra.mxu0 %v1224_v6 }
 0x128   : > { %v4346_v30 = vpop.f32.mrf.mxu0  ;;  %1309 = vmatpush1.msra.mxu1 %v1189_v29  ;;  %1441 = vmatprep.subr.mxu0 %v3845_v1 }
 0x129   : > { %1310 = vmatprep.subr.mxu1 %v1187_v33  ;;  %1442 = vmatpush2.msra.mxu0 %v1221_v5 }
 0x12a   : > { %v4352_v21 = vpop.f32.mrf.mxu0  ;;  %1311 = vmatpush1.msra.mxu1 %v1186_v48  ;;  %1443 = vmatprep.subr.mxu0 %v3845_v1 }
 0x12b   : > { %1312 = vmatprep.subr.mxu1 %v1184_v25  ;;  %1444 = vmatpush2.msra.mxu0 %v1218_v34 }
 0x12c   : > { %v4362_v31 = vpop.f32.mrf.mxu0  ;;  %1313 = vmatpush1.msra.mxu1 %v1183_v32  ;;  %1445 = vmatprep.subr.mxu0 %v3845_v1  ;;  %v1225_v32 = vmax.f32 %v4346_v30, 0.0  ;;  %v1214_v30 = vmax.f32 %v4307_v15, 0.0 }
 0x12d   : > { %1314 = vmatprep.subr.mxu1 %v1181_v16  ;;  %1446 = vmatpush2.msra.mxu0 %v1215_v39  ;;  %v1228_v25 = vmax.f32 %v4362_v31, 0.0  ;;  %v1226_v39 = vmax.f32 %v4352_v21, 0.0  ;;  %v1223_v16 = vmax.f32 %v4340_v38, 0.0  ;;  %v1217_v31 = vmax.f32 %v4316_v27, 0.0 }
 0x12e   : > { %v4372_v36 = vpop.f32.mrf.mxu0  ;;  %1315 = vmatpush1.msra.mxu1 %v1180_v14  ;;  %1448 = vmatmul.mubr.f32.vlgmr.msra.gmra.mxu0 %v4359_v26  ;;  %v1222_v14 = vmax.f32 %v4334_v3, 0.0  ;;  %v1216_v21 = vmax.f32 %v4311_v51, 0.0  ;;  %v1213_v38 = vmax.f32 %v4304_v44, 0.0 }
 0x12f   : > { %1316 = vmatprep.subr.mxu1 %v1178_v4  ;;  %3533 = vmatprep.mubr.msk.f32.mxu0 %vm1281_vm3, %v4368_v7  ;;  %v1229_v48 = vmax.f32 %v4372_v36, 0.0  ;;  %v1220_v4 = vmax.f32 %v4328_v61, 0.0 }
 0x130   : > { %v925_v37 = vpop.f32.mrf.mxu0  ;;  %1317 = vmatpush1.msra.mxu1 %v1177_v35  ;;  %v1219_v35 = vmax.f32 %v4322_v19, 0.0 }
 0x131   : > { %1318 = vmatprep.subr.mxu1 %v1175_v62  ;;  %v1231_v34 = vmax.f32 %v925_v37, 0.0  ;;  %v1279_v37 = vpop.permute.xlu0 %1278 }
 0x132   : > { %v927_v2 = vpop.f32.mrf.mxu0  ;;  %1319 = vmatpush1.msra.mxu1 %v1174_v60  ;;  %1453 = vmatmul.mubr.f32.gmra.mxu0 %v4379_v42 }
 0x133   : > { %1320 = vmatprep.subr.mxu1 %v1172_v56  ;;  %3534 = vmatprep.mubr.msk.f32.mxu0 %vm1281_vm3, %v4387_v58  ;;  %v1232_v33 = vmax.f32 %v927_v2, 0.0 }
 0x134   : > { %v931_v9 = vpop.f32.mrf.mxu0  ;;  %1321 = vmatpush1.msra.mxu1 %v1171_v40  ;;  %v1269_v40 = vpop.permute.xlu1 %1268 }
 0x135   : > { %1322 = vmatprep.subr.mxu1 %v1169_v59  ;;  %v1234_v29 = vmax.f32 %v931_v9, 0.0 }
 0x136   : > { %v933_v20 = vpop.f32.mrf.mxu0  ;;  %1323 = vmatpush1.msra.mxu1 %v1168_v52  ;;  %1458 = vmatmul.mubr.f32.gmra.mxu0 %v4396_v54 }
 0x137   : > { %1324 = vmatprep.subr.mxu1 %v1166_v47  ;;  %3535 = vmatprep.mubr.msk.f32.mxu0 %vm1281_vm3, %v4404_v50  ;;  %v1235_v5 = vmax.f32 %v933_v20, 0.0 }
 0x138   : > { %v937_v17 = vpop.f32.mrf.mxu0  ;;  %1325 = vmatpush1.msra.mxu1 %v1165_v18  ;;  %v1264_v47 = vpop.permute.xlu1 %1263 }
 0x139   : > { %v1237_v49 = vmax.f32 %v937_v17, 0.0 }
 0x13a   : > { %v939_v24 = vpop.f32.mrf.mxu0  ;;  %1463 = vmatmul.mubr.f32.gmra.mxu0 %v4412_v45 }
 0x13b   : > { %2576 = vmatprep.mubr.f32.mxu0 %v3845_v1  ;;  %v1238_v46 = vmax.f32 %v939_v24, 0.0  ;;  %v1468_v24 = vld [vmem:[%s4734_s4] sm:$0xff] }
 0x13c   : > { %v943_v41 = vpop.f32.mrf.mxu0 }
 0x13d   : > { %v1240_v6 = vmax.f32 %v943_v41, 0.0 }
 0x13e   : > { %v945_v43 = vpop.f32.mrf.mxu0 }
 0x13f   : > { %v1241_v63 = vmax.f32 %v945_v43, 0.0 }
 0x140   : > { %v949_v57 = vpop.f32.mrf.mxu0 }
 0x141   : > { %v1243_v28 = vmax.f32 %v949_v57, 0.0  ;;  %v1469_v57 = vld [vmem:[%s4734_s4 + $0x8] sm:$0xff] }
 0x142   : > { %v951_v53 = vpop.f32.mrf.mxu0 }
 0x143   : > { %v1244_v55 = vmax.f32 %v951_v53, 0.0 }
 0x144   : > { %v955_v8 = vpop.f32.mrf.mxu0 }
 0x145   : > { %v1246_v10 = vmax.f32 %v955_v8, 0.0 }
 0x146   : > { %v957_v22 = vpop.f32.mrf.mxu0 }
 0x147   : > { %v1247_v23 = vmax.f32 %v957_v22, 0.0  ;;  %v1470_v22 = vld [vmem:[%s4734_s4 + $0x10] sm:$0xff] }
 0x149   : > { %1334 = vmatprep.subr.mxu1 %v1247_v23  ;;  %v1471_v23 = vld [vmem:[%s4734_s4 + $0x18] sm:$0xff] }
 0x14a   : > { %1335 = vmatpush2.msra.mxu1 %v1246_v10  ;;  %v1489_v10 = vpop.permute.xlu1 %1488 }
 0x14b   : > { %1336 = vmatprep.subr.mxu1 %v1244_v55 }
 0x14c   : > { %1337 = vmatpush2.msra.mxu1 %v1243_v28 }
 0x14d   : > { %1338 = vmatprep.subr.mxu1 %v1241_v63 }
 0x14e   : > { %1339 = vmatpush2.msra.mxu1 %v1240_v6  ;;  %v1479_v6 = vpop.permute.xlu1 %1478 }
 0x14f   : > { %1340 = vmatprep.subr.mxu1 %v1238_v46 }
 0x150   : > { %1341 = vmatpush2.msra.mxu1 %v1237_v49 }
 0x151   : > { %1342 = vmatprep.subr.mxu1 %v1235_v5 }
 0x152   : > { %1343 = vmatpush2.msra.mxu1 %v1234_v29 }
 0x153   : > { %1344 = vmatprep.subr.mxu1 %v1232_v33 }
 0x154   : > { %1345 = vmatpush2.msra.mxu1 %v1231_v34 }
 0x155   : > { %1346 = vmatprep.subr.mxu1 %v1229_v48 }
 0x156   : > { %1347 = vmatpush2.msra.mxu1 %v1228_v25 }
 0x157   : > { %1348 = vmatprep.subr.mxu1 %v1226_v39 }
 0x158   : > { %1349 = vmatpush2.msra.mxu1 %v1225_v32 }
 0x159   : > { %1350 = vmatprep.subr.mxu1 %v1223_v16 }
 0x15a   : > { %1351 = vmatpush2.msra.mxu1 %v1222_v14 }
 0x15b   : > { %1352 = vmatprep.subr.mxu1 %v1220_v4 }
 0x15c   : > { %1353 = vmatpush2.msra.mxu1 %v1219_v35 }
 0x15d   : > { %1354 = vmatprep.subr.mxu1 %v1217_v31 }
 0x15e   : > { %1355 = vmatpush2.msra.mxu1 %v1216_v21 }
 0x15f   : > { %1356 = vmatprep.subr.mxu1 %v1214_v30 }
 0x160   : > { %1357 = vmatpush2.msra.mxu1 %v1213_v38 }
 0x161   : > { %1359 = vmatmul.mubr.f32.vlgmr.msra.gmra.mxu1 %v4359_v26 }
 0x162   : > { %3529 = vmatprep.mubr.msk.f32.mxu1 %vm1281_vm3, %v4368_v7 }
 0x165   : > { %1365 = vmatmul.mubr.f32.gmra.mxu1 %v4379_v42 }
 0x166   : > { %3530 = vmatprep.mubr.msk.f32.mxu1 %vm1281_vm3, %v4387_v58 }
 0x169   : > { %1371 = vmatmul.mubr.f32.gmra.mxu1 %v4396_v54  ;;  %v1274_v54 = vpop.permute.xlu0 %1273 }
 0x16a   : > { %3531 = vmatprep.mubr.msk.f32.mxu1 %vm1281_vm3, %v4404_v50 }
 0x16d   : > { %1377 = vmatmul.mubr.f32.gmra.mxu1 %v4412_v45  ;;  %v1494_v55 = vpop.permute.xlu0 %1493 }
 0x16e   : > { %1573 = vmatprep.mubr.f32.mxu1 %v3845_v1 }
 0x171   : > { %v1484_v5 = vpop.permute.xlu0 %1483 }
 0x1ee   : > { %v1449_v44 = vpop.f32.mrf.mxu0 }
 0x1ef   : > { %v4483_v8 = vadd.f32 %v1449_v44, %v1264_v47 }
 0x1f0   : > { %v1451_v15 = vpop.f32.mrf.mxu0 }
 0x1f2   : > { %v1454_v51 = vpop.f32.mrf.mxu0 }
 0x1f3   : > { %v4479_v53 = vadd.f32 %v1454_v51, %v1269_v40 }
 0x1f4   : > { %v1456_v27 = vpop.f32.mrf.mxu0 }
 0x1f6   : > { %v1459_v19 = vpop.f32.mrf.mxu0 }
 0x1f7   : > { %v4470_v43 = vadd.f32 %v1459_v19, %v1274_v54 }
 0x1f8   : > { %v1461_v61 = vpop.f32.mrf.mxu0 }
 0x1fa   : > { %v1464_v3 = vpop.f32.mrf.mxu0 }
 0x1fb   : > { %v4466_v41 = vadd.f32 %v1464_v3, %v1279_v37 }
 0x1fc   : > { %v1466_v26 = vpop.f32.mrf.mxu0 }
 0x221   : > { %v1360_v7 = vpop.f32.mrf.mxu1 }
 0x222   : > { %v4460_v17 = vadd.f32 %v1360_v7, %v1264_v47 }
 0x223   : > { %v1362_v36 = vpop.f32.mrf.mxu1 }
 0x224   : > { %v4457_v45 = vadd.f32 %v1362_v36, %v1264_v47 }
 0x225   : > { %v1366_v62 = vpop.f32.mrf.mxu1 }
 0x226   : > { %v4454_v20 = vadd.f32 %v1366_v62, %v1269_v40 }
 0x227   : > { %v1368_v42 = vpop.f32.mrf.mxu1 }
 0x228   : > { %v4451_v18 = vadd.f32 %v1368_v42, %v1269_v40 }
 0x229   : > { %v1372_v60 = vpop.f32.mrf.mxu1 }
 0x22a   : > { %v4448_v50 = vadd.f32 %v1372_v60, %v1274_v54 }
 0x22b   : > { %v1374_v58 = vpop.f32.mrf.mxu1 }
 0x22c   : > { %v4445_v9 = vadd.f32 %v1374_v58, %v1274_v54 }
 0x22d   : > { %v1378_v56 = vpop.f32.mrf.mxu1 }
 0x22e   : > { %v4443_v52 = vadd.f32 %v1378_v56, %v1279_v37 }
 0x22f   : > { %v1380_v2 = vpop.f32.mrf.mxu1 }
 0x230   : > { %v4441_v59 = vadd.f32 %v1380_v2, %v1279_v37 }
 0x232   : > { %1533 = vmatprep.subr.mxu1 %v4441_v59 }
 0x233   : > { %1534 = vmatpush1.msra.mxu1 %v4443_v52 }
 0x234   : > { %1535 = vmatprep.subr.mxu1 %v4445_v9 }
 0x235   : > { %1536 = vmatpush1.msra.mxu1 %v4448_v50 }
 0x236   : > { %1537 = vmatprep.subr.mxu1 %v4451_v18 }
 0x237   : > { %1538 = vmatpush1.msra.mxu1 %v4454_v20 }
 0x238   : > { %1539 = vmatprep.subr.mxu1 %v4457_v45 }
 0x239   : > { %1540 = vmatpush1.msra.mxu1 %v4460_v17 }
 0x23a   : > { %3536 = vmatmul.mubr.msk.f32.vlgmr.msra.gmra.mxu1 %vm1496_vm4, %v1468_v24  ;;  %3677 = vmatprep.subr.mxu1 %v4466_v41 }
 0x23b   : > { %3678 = vmatpush3.msra.mxu1 %v4466_v41  ;;  %1579 = vmatprep.mubr.f32.mxu1 %v3845_v1 }
 0x23c   : > { %3679 = vmatprep.subr.mxu1 %v4470_v43 }
 0x23d   : > { %3680 = vmatpush3.msra.mxu1 %v4470_v43 }
 0x23e   : > { %3537 = vmatmul.mubr.msk.f32.gmra.mxu1 %vm1496_vm4, %v1469_v57  ;;  %3681 = vmatprep.subr.mxu1 %v4479_v53 }
 0x23f   : > { %3682 = vmatpush3.msra.mxu1 %v4479_v53  ;;  %1585 = vmatprep.mubr.f32.mxu1 %v3845_v1 }
 0x240   : > { %3683 = vmatprep.subr.mxu1 %v4483_v8 }
 0x241   : > { %3684 = vmatpush3.msra.mxu1 %v4483_v8 }
 0x242   : > { %3538 = vmatmul.mubr.msk.f32.gmra.mxu1 %vm1496_vm4, %v1470_v22 }
 0x243   : > { %1591 = vmatprep.mubr.f32.mxu1 %v3845_v1 }
 0x246   : > { %3539 = vmatmul.mubr.msk.f32.gmra.mxu1 %vm1496_vm4, %v1471_v23 }
 0x247   : > { %3685 = vmatprep.mubr.msk.f32.mxu1 %vm1496_vm4, %v1468_v24 }
 0x24a   : > { %3686 = vmatmul.mubr.msk.f32.vlgmr.msra.gmra.mxu1 %vm1496_vm4, %v1469_v57 }
 0x24b   : > { %3688 = vmatprep.mubr.msk.f32.mxu1 %vm1496_vm4, %v1470_v22 }
 0x24e   : > { %3689 = vmatmul.mubr.msk.f32.gmra.mxu1 %vm1496_vm4, %v1471_v23 }
 0x24f   : > { %1841 = vmatprep.mubr.f32.mxu1 %v3845_v1 }
 0x2fa   : > { %v1575_v28 = vpop.f32.mrf.mxu1 }
 0x2fb   : > { %v1576_v4 = vadd.f32 %v1575_v28, %v1479_v6 }
 0x2fc   : > { %v1577_v63 = vpop.f32.mrf.mxu1 }
 0x2fd   : > { %v1578_v49 = vadd.f32 %v1577_v63, %v1479_v6  ;;  %v3544_v27 = vmul.f32 -1.442695, %v1576_v4 }
 0x2fe   : > { %v1581_v46 = vpop.f32.mrf.mxu1 }
 0x2ff   : > { %v3545_v48 = vmul.f32 -1.442695, %v1578_v49  ;;  %v1582_v39 = vadd.f32 %v1581_v46, %v1484_v5 }
 0x300   : > { %v1583_v29 = vpop.f32.mrf.mxu1 }
 0x301   : > { %v1584_v33 = vadd.f32 %v1583_v29, %v1484_v5  ;;  %3755 = vpow2.f32 %v3545_v48  ;;  %v3547_v38 = vmul.f32 -1.442695, %v1582_v39 }
 0x302   : > { %v1587_v34 = vpop.f32.mrf.mxu1 }
 0x303   : > { %v1588_v25 = vadd.f32 %v1587_v34, %v1489_v10  ;;  %v3548_v32 = vmul.f32 -1.442695, %v1584_v33 }
 0x304   : > { %v1589_v16 = vpop.f32.mrf.mxu1 }
 0x305   : > { %v1590_v14 = vadd.f32 %v1589_v16, %v1489_v10  ;;  %v3550_v35 = vmul.f32 -1.442695, %v1588_v25  ;;  %3757 = vpow2.f32 %v3548_v32 }
 0x306   : > { %v1593_v31 = vpop.f32.mrf.mxu1 }
 0x307   : > { %v3551_v21 = vmul.f32 -1.442695, %v1590_v14  ;;  %v1594_v30 = vadd.f32 %v1593_v31, %v1494_v55 }
 0x308   : > { %v1595_v44 = vpop.f32.mrf.mxu1 }
 0x309   : > { %3759 = vpow2.f32 %v3551_v21  ;;  %v3553_v15 = vmul.f32 -1.442695, %v1594_v30  ;;  %v1596_v51 = vadd.f32 %v1595_v44, %v1494_v55 }
 0x30a   : > { %3761 = vpow2.f32 %v3550_v35  ;;  %v3687_v19 = vpop.f32.mrf.mxu1 }
 0x30b   : > { %3763 = vpow2.f32 %v3553_v15  ;;  %v3554_v61 = vmul.f32 -1.442695, %v1596_v51  ;;  %v1670_v3 = vadd.f32 %v3687_v19, %v1484_v5 }
 0x30c   : > { %3765 = vpow2.f32 %v3547_v38  ;;  %v1664_v26 = vpop.f32.mrf.mxu1 }
 0x30d   : > { %3767 = vpow2.f32 %v3554_v61  ;;  %v1665_v7 = vadd.f32 %v1664_v26, %v1479_v6  ;;  %v3549_v62 = vmul.f32 -1.442695, %v1670_v3 }
 0x30e   : > { %3769 = vpow2.f32 %v3544_v27  ;;  %v3690_v36 = vpop.f32.mrf.mxu1  ;;  %v3756_v2 = vpop.eup %3755 }
 0x30f   : > { %v1680_v42 = vadd.f32 %v3690_v36, %v1494_v55  ;;  %v3546_v37 = vmul.f32 -1.442695, %v1665_v7  ;;  %3771 = vpow2.f32 %v3549_v62  ;;  %v1720_v5 = vadd.f32 1.0, %v3756_v2 }
 0x310   : > { %v1674_v60 = vpop.f32.mrf.mxu1 }
 0x311   : > { %v3555_v58 = vmul.f32 -1.442695, %v1680_v42  ;;  %v1675_v56 = vadd.f32 %v1674_v60, %v1489_v10 }
 0x312   : > { %v3758_v54 = vpop.eup %3757 }
 0x313   : > { %v3552_v40 = vmul.f32 -1.442695, %v1675_v56  ;;  %3773 = vpow2.f32 %v3555_v58  ;;  %v1723_v46 = vadd.f32 1.0, %v3758_v54 }
 0x314   : > { %3775 = vpow2.f32 %v3546_v37 }
 0x315   : > { %3777 = vpow2.f32 %v3552_v40 }
 0x316   : > { %v3760_v47 = vpop.eup %3759 }
 0x317   : > { %v3762_v24 = vpop.eup %3761  ;;  %v1726_v57 = vadd.f32 1.0, %v3760_v47 }
 0x318   : > { %v3764_v22 = vpop.eup %3763  ;;  %v1725_v6 = vadd.f32 1.0, %v3762_v24 }
 0x319   : > { %v3766_v23 = vpop.eup %3765  ;;  %v1728_v28 = vadd.f32 1.0, %v3764_v22  ;;  %3779 = vrcp.f32 %v1726_v57  ;;  %v2084_v57 = vld [vmem:[%s4739_s9] sm:$0xf] }
 0x31a   : > { %v3768_v63 = vpop.eup %3767  ;;  %v1722_v10 = vadd.f32 1.0, %v3766_v23  ;;  %v1772_v23 = vpop.permute.xlu1 %1771 }
 0x31b   : > { %v3770_v55 = vpop.eup %3769  ;;  %v1729_v49 = vadd.f32 1.0, %v3768_v63  ;;  %3781 = vrcp.f32 %v1728_v28 }
 0x31c   : > { %v1719_v29 = vadd.f32 1.0, %v3770_v55  ;;  %v3772_v33 = vpop.eup %3771 }
 0x31d   : > { %3783 = vrcp.f32 %v1729_v49  ;;  %v1724_v32 = vadd.f32 1.0, %v3772_v33 }
 0x31e   : > { %3785 = vrcp.f32 %v1725_v6 }
 0x31f   : > { %3787 = vrcp.f32 %v1723_v46 }
 0x320   : > { %3789 = vrcp.f32 %v1722_v10  ;;  %v3774_v34 = vpop.eup %3773 }
 0x321   : > { %3791 = vrcp.f32 %v1720_v5  ;;  %v3776_v48 = vpop.eup %3775  ;;  %v1730_v25 = vadd.f32 1.0, %v3774_v34  ;;  %v2089_v34 = vpop.permute.xlu0 %2088 }
 0x322   : > { %3793 = vrcp.f32 %v1719_v29  ;;  %v3778_v39 = vpop.eup %3777  ;;  %v1721_v14 = vadd.f32 1.0, %v3776_v48 }
 0x323   : > { %3795 = vrcp.f32 %v1730_v25  ;;  %v1727_v16 = vadd.f32 1.0, %v3778_v39 }
 0x325   : > { %3797 = vrcp.f32 %v1727_v16 }
 0x326   : > { %v3780_v4 = vpop.eup %3779  ;;  %3799 = vrcp.f32 %v1724_v32 }
 0x327   : > { %3801 = vrcp.f32 %v1721_v14  ;;  %v1762_v51 = vmul.f32 %v3780_v4, %v4445_v9  ;;  %v1767_v9 = vld [vmem:[%s4736_s6] sm:$0xf] }
 0x328   : > { %v3782_v35 = vpop.eup %3781 }
 0x329   : > { %v1764_v44 = vmul.f32 %v3782_v35, %v4443_v52 }
 0x32a   : > { %v3784_v31 = vpop.eup %3783 }
 0x32b   : > { %v3786_v21 = vpop.eup %3785  ;;  %v1765_v30 = vmul.f32 %v3784_v31, %v4441_v59 }
 0x32c   : > { %v3788_v38 = vpop.eup %3787  ;;  %v1761_v19 = vmul.f32 %v3786_v21, %v4448_v50 }
 0x32d   : > { %v3790_v15 = vpop.eup %3789  ;;  %1801 = vmatprep.subr.mxu1 %v1765_v30  ;;  %v1759_v3 = vmul.f32 %v3788_v38, %v4451_v18 }
 0x32e   : > { %v3792_v27 = vpop.eup %3791  ;;  %1802 = vmatpush1.msra.mxu1 %v1764_v44  ;;  %v1758_v26 = vmul.f32 %v3790_v15, %v4454_v20 }
 0x32f   : > { %v3794_v61 = vpop.eup %3793  ;;  %1803 = vmatprep.subr.mxu1 %v1762_v51  ;;  %v1756_v59 = vmul.f32 %v3792_v27, %v4457_v45 }
 0x330   : > { %1804 = vmatpush1.msra.mxu1 %v1761_v19  ;;  %v3796_v7 = vpop.eup %3795  ;;  %v1755_v52 = vmul.f32 %v3794_v61, %v4460_v17 }
 0x331   : > { %1805 = vmatprep.subr.mxu1 %v1759_v3  ;;  %v1766_v50 = vmul.f32 %v3796_v7, %v4466_v41 }
 0x332   : > { %1806 = vmatpush1.msra.mxu1 %v1758_v26  ;;  %v3798_v36 = vpop.eup %3797 }
 0x333   : > { %1807 = vmatprep.subr.mxu1 %v1756_v59  ;;  %v3800_v18 = vpop.eup %3799  ;;  %v1763_v20 = vmul.f32 %v3798_v36, %v4470_v43  ;;  %v1918_v43 = vld [vmem:[%s4738_s8] sm:$0xff] }
 0x334   : > { %1808 = vmatpush1.msra.mxu1 %v1755_v52  ;;  %v3802_v45 = vpop.eup %3801  ;;  %v1760_v17 = vmul.f32 %v3800_v18, %v4479_v53 }
 0x335   : > { %3556 = vmatmul.mubr.msk.f32.vlgmr.msra.gmra.mxu1 %vm1496_vm4, %v1767_v9  ;;  %3691 = vmatprep.subr.mxu1 %v3845_v1  ;;  %v1757_v41 = vmul.f32 %v3802_v45, %v4483_v8 }
 0x336   : > { %3692 = vmatpush3.msra.mxu1 %v1766_v50  ;;  %3699 = vmatprep.mubr.msk.f32.mxu1 %vm3847_vm5, %v3845_v1 }
 0x337   : > { %3693 = vmatprep.subr.mxu1 %v3845_v1 }
 0x338   : > { %3694 = vmatpush3.msra.mxu1 %v1763_v20 }
 0x339   : > { %3695 = vmatprep.subr.mxu1 %v3845_v1 }
 0x33a   : > { %3696 = vmatpush3.msra.mxu1 %v1760_v17 }
 0x33b   : > { %3697 = vmatprep.subr.mxu1 %v3845_v1 }
 0x33c   : > { %3698 = vmatpush3.msra.mxu1 %v1757_v41 }
 0x33d   : > { %3700 = vmatmul.mubr.msk.f32.vlgmr.msra.gmra.mxu1 %vm1496_vm4, %v1767_v9  ;;  %3558 = vmatprep.subr.msk.mxu1 %vm717_vm2, %v3979_v11  ;;  %v1919_v11 = vld [vmem:[%s4738_s8 + $0x8] sm:$0xff]  ;;  %vm2744_vm4 = vcmask 916480  }
 0x33e   : > { %3559 = vmatpush1.msk.msra.mxu1 %vm717_vm2, %v3983_v13  ;;  %1990 = vmatprep.mubr.f32.mxu1 %v3845_v1 }
 0x33f   : > { %3702 = vmatprep.subr.msk.mxu1 %vm717_vm2, %v3981_v12 }
 0x341   : > { %3560 = vmatmul.mubr.msk.f32.vlgmr.msra.gmra.mxu1 %vm632_vm0, %v1918_v43 }
 0x342   : > { %1996 = vmatprep.mubr.f32.mxu1 %v3845_v1  ;;  %3703 = vmatpush3.msk.msra.mxu1 %vm717_vm2, %v3981_v12 }
 0x345   : > { %3561 = vmatmul.mubr.msk.f32.gmra.mxu1 %vm632_vm0, %v1919_v11 }
 0x346   : > { %3704 = vmatprep.mubr.msk.f32.mxu1 %vm632_vm0, %v1918_v43 }
 0x349   : > { %3705 = vmatmul.mubr.msk.f32.vlgmr.msra.gmra.mxu1 %vm632_vm0, %v1919_v11  ;;  %vm2496_vm0 = vcmask 1039360  }
 0x34a   : > { %2159 = vmatprep.mubr.f32.mxu1 %v3845_v1 }
 0x3f5   : > { %v1843_v13 = vpop.f32.mrf.mxu1 }
 0x3f6   : > { %v1844_v28 = vadd.f32 %v1843_v13, %v1772_v23 }
 0x3f7   : > { %v1845_v53 = vpop.f32.mrf.mxu1 }
 0x3f8   : > { %v4557_v63 = vadd.f32 %v1845_v53, %v1772_v23  ;;  %v2237_v6 = vsel %vm2236_vm7, %v1844_v28, -inf }
 0x3f9   : > { %v2238_v46 = vrot.slane %v2237_v6, 4 }
 0x3fa   : > { %v2244_v49 = vsel %vm2236_vm7, %v4557_v63, -inf }
 0x3fb   : > { %v2245_v5 = vrot.slane %v2244_v49, 4  ;;  %v2239_v29 = vmax.f32 %v2237_v6, %v2238_v46 }
 0x3fd   : > { %v1914_v8 = vpop.f32.mrf.mxu1  ;;  %v2246_v48 = vmax.f32 %v2244_v49, %v2245_v5  ;;  %v2240_v39 = vrot.slane %v2239_v29, 2 }
 0x3fe   : > { %v4560_v55 = vadd.f32 %v1914_v8, %v1772_v23 }
 0x3ff   : > { %v3701_v62 = vpop.f32.mrf.mxu1  ;;  %v2247_v31 = vrot.slane %v2246_v48, 2  ;;  %v2241_v38 = vmax.f32 %v2239_v29, %v2240_v39 }
 0x400   : > { %v2252_v10 = vsel %vm2251_vm8, %v4560_v55, -inf }
 0x401   : > { %v1992_v42 = vpop.f32.mrf.mxu1  ;;  %v2253_v33 = vrot.slane %v2252_v10, 4  ;;  %v2248_v26 = vmax.f32 %v2246_v48, %v2247_v31  ;;  %v2242_v9 = vrot.slane %v2241_v38, 1 }
 0x402   : > { %v2078_v54 = vmax.f32 %v1992_v42, 0.0 }
 0x403   : > { %v1994_v60 = vpop.f32.mrf.mxu1  ;;  %v2254_v16 = vmax.f32 %v2252_v10, %v2253_v33  ;;  %v2249_v45 = vrot.slane %v2248_v26, 1  ;;  %v2243_v11 = vmax.f32 %v2241_v38, %v2242_v9 }
 0x404   : > { %v2079_v12 = vmax.f32 %v1994_v60, 0.0 }
 0x405   : > { %v1998_v37 = vpop.f32.mrf.mxu1  ;;  %v2255_v51 = vrot.slane %v2254_v16, 2  ;;  %v2250_v42 = vmax.f32 %v2248_v26, %v2249_v45 }
 0x406   : > { %v2081_v40 = vmax.f32 %v1998_v37, 0.0 }
 0x407   : > { %v2000_v58 = vpop.f32.mrf.mxu1  ;;  %v2256_v36 = vmax.f32 %v2254_v16, %v2255_v51 }
 0x408   : > { %v2082_v56 = vmax.f32 %v2000_v58, 0.0 }
 0x409   : > { %v3706_v2 = vpop.f32.mrf.mxu1  ;;  %v2257_v13 = vrot.slane %v2256_v36, 1 }
 0x40a   : > { %2123 = vmatprep.subr.mxu1 %v2082_v56  ;;  %v2083_v47 = vmax.f32 %v3706_v2, 0.0  ;;  %v2259_v56 = vsub.f32 %v1844_v28, %v2243_v11 }
 0x40b   : > { %2124 = vmatpush1.msra.mxu1 %v2081_v40  ;;  %v2069_v24 = vpop.f32.mrf.mxu1  ;;  %v2258_v40 = vmax.f32 %v2256_v36, %v2257_v13 }
 0x40c   : > { %2125 = vmatprep.subr.mxu1 %v2079_v12  ;;  %v2080_v22 = vmax.f32 %v2069_v24, 0.0 }
 0x40d   : > { %2126 = vmatpush1.msra.mxu1 %v2078_v54  ;;  %v2261_v6 = vsub.f32 %v4560_v55, %v2258_v40 }
 0x40e   : > { %3565 = vmatmul.mubr.msk.f32.vlgmr.msra.gmra.mxu1 %vm2091_vm6, %v2084_v57  ;;  %3707 = vmatprep.subr.mxu1 %v3845_v1 }
 0x40f   : > { %3708 = vmatpush3.msra.mxu1 %v2083_v47  ;;  %3711 = vmatprep.mubr.msk.f32.mxu1 %vm3847_vm5, %v3845_v1  ;;  %v2260_v47 = vsub.f32 %v4557_v63, %v2250_v42 }
 0x410   : > { %3709 = vmatprep.subr.mxu1 %v3845_v1 }
 0x411   : > { %3710 = vmatpush3.msra.mxu1 %v2080_v22 }
 0x412   : > { %3712 = vmatmul.mubr.msk.f32.vlgmr.msra.gmra.mxu1 %vm2091_vm6, %v2084_v57 }
 0x413   : > { %2649 = vmatprep.mubr.f32.mxu1 %v3845_v1 }
 0x4ce   : > { %v2161_v25 = vpop.f32.mrf.mxu1 }
 0x4cf   : > { %v2162_v32 = vadd.f32 %v2161_v25, %v2089_v34 }
 0x4d0   : > { %v2163_v14 = vpop.f32.mrf.mxu1 }
 0x4d1   : > { %v2262_v4 = vsel %vm2236_vm7, %v2162_v32, -inf  ;;  %v2164_v35 = vadd.f32 %v2163_v14, %v2089_v34 }
 0x4d2   : > { %v2263_v21 = vrot.slane %v2262_v4, 4  ;;  %v2232_v30 = vpop.f32.mrf.mxu1 }
 0x4d3   : > { %v2269_v44 = vsel %vm2236_vm7, %v2164_v35, -inf  ;;  %v2233_v15 = vadd.f32 %v2232_v30, %v2089_v34 }
 0x4d4   : > { %v2264_v27 = vmax.f32 %v2262_v4, %v2263_v21  ;;  %v2270_v19 = vrot.slane %v2269_v44, 4  ;;  %v3713_v61 = vpop.f32.mrf.mxu1 }
 0x4d5   : > { %v2276_v3 = vsel %vm2251_vm8, %v2233_v15, -inf }
 0x4d6   : > { %v2265_v7 = vrot.slane %v2264_v27, 2  ;;  %v2271_v59 = vmax.f32 %v2269_v44, %v2270_v19  ;;  %v2277_v52 = vrot.slane %v2276_v3, 4 }
 0x4d8   : > { %v2266_v50 = vmax.f32 %v2264_v27, %v2265_v7  ;;  %v2272_v18 = vrot.slane %v2271_v59, 2  ;;  %v2278_v20 = vmax.f32 %v2276_v3, %v2277_v52 }
 0x4da   : > { %v2267_v17 = vrot.slane %v2266_v50, 1  ;;  %v2273_v41 = vmax.f32 %v2271_v59, %v2272_v18  ;;  %v2279_v43 = vrot.slane %v2278_v20, 2  ;;  %v4579_v18 = vand.u32 127, %v585_v0 }
 0x4dc   : > { %v2268_v53 = vmax.f32 %v2266_v50, %v2267_v17  ;;  %v2274_v8 = vrot.slane %v2273_v41, 1  ;;  %v2280_v62 = vmax.f32 %v2278_v20, %v2279_v43  ;;  %vm2374_vm9 = vcmp.ge.s32.totalorder %v4579_v18, 16 }
 0x4de   : > { %v2283_v60 = vsub.f32 %v2162_v32, %v2268_v53  ;;  %v2275_v37 = vmax.f32 %v2273_v41, %v2274_v8  ;;  %v2281_v58 = vrot.slane %v2280_v62, 1 }
 0x4e0   : > { %v2289_v2 = vrot.slane %v2283_v60, 4  ;;  %v2284_v12 = vsub.f32 %v2164_v35, %v2275_v37  ;;  %v2282_v54 = vmax.f32 %v2280_v62, %v2281_v58 }
 0x4e2   : > { %v2295_v24 = vsel %vm2236_vm7, %v2259_v56, %v2289_v2  ;;  %v2290_v57 = vrot.slane %v2284_v12, 4  ;;  %v2285_v22 = vsub.f32 %v2233_v15, %v2282_v54 }
 0x4e3   : > { %v2298_v23 = vmul.f32 1.442695, %v2295_v24 }
 0x4e4   : > { %v2296_v46 = vsel %vm2236_vm7, %v2260_v47, %v2290_v57  ;;  %v2291_v49 = vrot.slane %v2285_v22, 4 }
 0x4e5   : > { %3803 = vpow2.f32 %v2298_v23  ;;  %v2300_v10 = vmul.f32 1.442695, %v2296_v46 }
 0x4e6   : > { %v2297_v28 = vsel %vm2236_vm7, %v2261_v6, %v2291_v49 }
 0x4e7   : > { %3805 = vpow2.f32 %v2300_v10  ;;  %v2302_v42 = vmul.f32 1.442695, %v2297_v28 }
 0x4f2   : > { %v3804_v5 = vpop.eup %3803 }
 0x4f3   : > { %v2304_v29 = vsel %vm2236_vm7, %v3804_v5, 0.0  ;;  %v2331_v33 = vrot.slane %v3804_v5, 4 }
 0x4f4   : > { %v3806_v63 = vpop.eup %3805  ;;  %v2305_v34 = vrot.slane %v2304_v29, 4 }
 0x4f5   : > { %v2337_v48 = vsel %vm2236_vm7, %v2331_v33, 0.0  ;;  %v2311_v25 = vsel %vm2236_vm7, %v3806_v63, 0.0  ;;  %v2332_v39 = vrot.slane %v3806_v63, 4 }
 0x4f6   : > { %v2306_v55 = vadd.f32 %v2305_v34, %v2304_v29  ;;  %v2338_v32 = vrot.slane %v2337_v48, 4  ;;  %v2312_v16 = vrot.slane %v2311_v25, 4  ;;  %v4596_v29 = vadd.s32 256, %v4579_v18 }
 0x4f7   : > { %v2344_v14 = vsel %vm2236_vm7, %v2332_v39, 0.0 }
 0x4f8   : > { %v2307_v4 = vrot.slane %v2306_v55, 2  ;;  %v2339_v35 = vadd.f32 %v2338_v32, %v2337_v48  ;;  %v2313_v31 = vadd.f32 %v2312_v16, %v2311_v25  ;;  %v2345_v21 = vrot.slane %v2344_v14, 4  ;;  %v4609_v32 = vld [vmem:[%s4741_s11] sm:$0xff] }
 0x4f9   : > { %vm2386_vm10 = vcmp.lt.s32.totalorder %v4596_v29, 272 }
 0x4fa   : > { %v2308_v30 = vadd.f32 %v2307_v4, %v2306_v55  ;;  %v2340_v38 = vrot.slane %v2339_v35, 2  ;;  %v2314_v44 = vrot.slane %v2313_v31, 2  ;;  %v2346_v15 = vadd.f32 %v2345_v21, %v2344_v14 }
 0x4fc   : > { %v2309_v51 = vrot.slane %v2308_v30, 1  ;;  %v2341_v27 = vadd.f32 %v2340_v38, %v2339_v35  ;;  %v2315_v19 = vadd.f32 %v2314_v44, %v2313_v31  ;;  %v2347_v61 = vrot.slane %v2346_v15, 2 }
 0x4fd   : > { %v2410_v44 = vand.u32 15, %v4579_v18 }
 0x4fe   : > { %v2310_v3 = vadd.f32 %v2309_v51, %v2308_v30  ;;  %v2342_v26 = vrot.slane %v2341_v27, 1  ;;  %v2316_v7 = vrot.slane %v2315_v19, 1  ;;  %v2348_v59 = vadd.f32 %v2347_v61, %v2346_v15 }
 0x4ff   : > { %v2372_v30 = vadd.s32 128, %v4579_v18  ;;  %vm4642_vm15 = vcmp.gt.s32.totalorder %v2410_v44, 0  ;;  %vm2479_vm2 = vcmp.lt.s32.totalorder %v2410_v44, 15 }
 0x500   : > { %3807 = vrcp.f32 %v2310_v3  ;;  %v2343_v52 = vadd.f32 %v2342_v26, %v2341_v27  ;;  %v2317_v9 = vadd.f32 %v2316_v7, %v2315_v19  ;;  %v2349_v36 = vrot.slane %v2348_v59, 1 }
 0x501   : > { %v2417_v38 = vand.u32 15, %v2372_v30 }
 0x502   : > { %3809 = vrcp.f32 %v2343_v52  ;;  %v2350_v50 = vadd.f32 %v2349_v36, %v2348_v59 }
 0x503   : > { %3811 = vrcp.f32 %v2317_v9  ;;  %vm4636_vm14 = vcmp.gt.s32.totalorder %v2417_v38, 0  ;;  %vm2480_vm1 = vcmp.lt.s32.totalorder %v2417_v38, 15 }
 0x504   : > { %3813 = vrcp.f32 %v2350_v50 }
 0x505   : > { %3815 = vpow2.f32 %v2302_v42 }
 0x50d   : > { %v3808_v20 = vpop.eup %3807 }
 0x50e   : > { %v2361_v41 = vmul.f32 %v3808_v20, %v3804_v5  ;;  %v2424_v20 = vand.u32 15, %v4596_v29 }
 0x50f   : > { %v3810_v45 = vpop.eup %3809 }
 0x510   : > { %v3812_v17 = vpop.eup %3811  ;;  %v2364_v43 = vmul.f32 %v3810_v45, %v3804_v5  ;;  %vm2481_vm5 = vcmp.lt.s32.totalorder %v2424_v20, 15  ;;  %vm2444_vm6 = vcmp.gt.s32.totalorder %v2424_v20, 0 }
 0x511   : > { %v3814_v11 = vpop.eup %3813  ;;  %v2362_v53 = vmul.f32 %v3812_v17, %v3806_v63 }
 0x512   : > { %v2367_v13 = vsel %vm2236_vm7, %v2361_v41, %v2364_v43  ;;  %v2365_v8 = vmul.f32 %v3814_v11, %v3806_v63  ;;  %v3816_v60 = vpop.eup %3815 }
 0x513   : > { %v4583_v62 = vsel %vm2374_vm9, %v2367_v13, 0.0  ;;  %v2333_v37 = vrot.slane %v3816_v60, 4  ;;  %v2318_v56 = vsel %vm2251_vm8, %v3816_v60, 0.0 }
 0x514   : > { %2446 = vrot.lane.b32.xlu0 %v4583_v62, %s3848_s18  ;;  %v4588_v0 = vsel %vm2236_vm7, %v2362_v53, %v2365_v8  ;;  %v2319_v2 = vrot.slane %v2318_v56, 4 }
 0x515   : > { %2449 = vrot.lane.b32.xlu1 %v4588_v0, %s3848_s18  ;;  %2542 = vmatprep.subr.mxu0 %v4588_v0  ;;  %v2351_v58 = vsel %vm2251_vm8, %v2333_v37, 0.0  ;;  %v3279_v37 = vld [vmem:[%s4744_s14] sm:$0xff] }
 0x516   : > { %3567 = vmatpush1.msk.msra.mxu0 %vm2374_vm9, %v2367_v13  ;;  %v2352_v40 = vrot.slane %v2351_v58, 4  ;;  %v2320_v54 = vadd.f32 %v2319_v2, %v2318_v56 }
 0x518   : > { %v2353_v12 = vadd.f32 %v2352_v40, %v2351_v58  ;;  %v2321_v24 = vrot.slane %v2320_v54, 2 }
 0x51a   : > { %v2354_v47 = vrot.slane %v2353_v12, 2  ;;  %v2322_v22 = vadd.f32 %v2321_v24, %v2320_v54 }
 0x51c   : > { %v2355_v57 = vadd.f32 %v2354_v47, %v2353_v12  ;;  %v2323_v6 = vrot.slane %v2322_v22, 1 }
 0x51e   : > { %v2356_v23 = vrot.slane %v2355_v57, 1  ;;  %v2324_v49 = vadd.f32 %v2323_v6, %v2322_v22 }
 0x520   : > { %v2357_v46 = vadd.f32 %v2356_v23, %v2355_v57 }
 0x522   : > { %3817 = vrcp.f32 %v2357_v46 }
 0x523   : > { %3819 = vrcp.f32 %v2324_v49 }
 0x52f   : > { %v3818_v10 = vpop.eup %3817 }
 0x530   : > { %v3820_v28 = vpop.eup %3819  ;;  %v2366_v5 = vmul.f32 %v3818_v10, %v3816_v60 }
 0x531   : > { %v2363_v33 = vmul.f32 %v3820_v28, %v3816_v60  ;;  %v3263_v60 = vld [vmem:[%s4742_s12] sm:$0xff] }
 0x533   : > { %v2369_v63 = vsel %vm2236_vm7, %v2363_v33, %v2366_v5 }
 0x534   : > { %v4600_v48 = vsel %vm2386_vm10, %v2369_v63, 0.0 }
 0x586   : > { %v2447_v34 = vpop.permute.xlu0 %2446 }
 0x587   : > { %v2448_v25 = vsel %vm2445_vm11, %v2447_v34, %v4600_v48  ;;  %v2450_v39 = vpop.permute.xlu1 %2449 }
 0x588   : > { %2464 = vrot.lane.b32.xlu1 %v2448_v25, %s3849_s19  ;;  %2451 = vrot.lane.b32.xlu0 %v2448_v25, %s3848_s18  ;;  %v2453_v55 = vsel %vm2445_vm11, %v2450_v39, %v2447_v34  ;;  %s3856_s18 = smov 80  }
 0x58c   : > { %2466 = vrot.lane.b32.xlu1 %v2453_v55, %s3849_s19 }
 0x590   : > { %2494 = vrot.lane.b32.xlu1 %v2448_v25, %s3850_s1 }
 0x594   : > { %2507 = vrot.lane.b32.xlu1 %v4609_v32, %s3851_s22 }
 0x598   : > { %2831 = vrot.lane.b32.xlu1 %v4600_v48, %s3852_s23 }
 0x59c   : > { %2827 = vrot.lane.b32.xlu1 %v4583_v62, %s3852_s23 }
 0x5fa   : > { %v2465_v16 = vpop.permute.xlu1 %2464  ;;  %v2452_v14 = vpop.permute.xlu0 %2451 }
 0x5fb   : > { %v2454_v4 = vsel %vm2445_vm11, %v2452_v14, %v2450_v39 }
 0x5fc   : > { %2468 = vrot.lane.b32.xlu0 %v2454_v4, %s3849_s19  ;;  %s3857_s19 = smov 72  }
 0x5fe   : > { %v2467_v35 = vpop.permute.xlu1 %2466 }
 0x5ff   : > { %v2471_v19 = vsel %vm2470_vm13, %v2465_v16, %v2467_v35 }
 0x600   : > { %2492 = vrot.lane.b32.xlu0 %v4588_v0, %s3850_s1  ;;  %v2476_v8 = vsel %vm4642_vm15, %v2471_v19, 0.0 }
 0x602   : > { %v4618_v31 = vpop.permute.xlu1 %2494 }
 0x603   : > { %v2504_v13 = vsel %vm2481_vm5, %v4618_v31, 0.0 }
 0x604   : > { %2490 = vrot.lane.b32.xlu0 %v4583_v62, %s3850_s1  ;;  %s3858_s1 = smov 64  }
 0x606   : > { %v2508_v21 = vpop.permute.xlu1 %2507 }
 0x607   : > { %3568 = vmatmul.mubr.msk.f32.vlgmr.msra.gmra.mxu0 %vm2509_vm12, %v2508_v21 }
 0x608   : > { %2656 = vrot.lane.b32.xlu0 %v4609_v32, %s3852_s23  ;;  %2724 = vmatprep.mubr.f32.mxu0 %v3845_v1 }
 0x60a   : > { %v2832_v9 = vpop.permute.xlu1 %2831 }
 0x60c   : > { %2829 = vrot.lane.b32.xlu0 %v4588_v0, %s3852_s23 }
 0x60e   : > { %v2828_v45 = vpop.permute.xlu1 %2827 }
 0x610   : > { %2733 = vrot.lane.b32.xlu0 %v4609_v32, %s3853_s28  ;;  %s581_s28 = scalar_lea.vmem %s4747_s17, %s3584_s20 }
 0x614   : > { %2824 = vrot.lane.b32.xlu0 %v4609_v32, %s3854_s29 }
 0x618   : > { %2912 = vrot.lane.b32.xlu0 %v4609_v32, %s3855_s30 }
 0x61c   : > { %3093 = vrot.lane.b32.xlu0 %v4588_v0, %s3854_s29  ;;  %v3290_v0 = vld [vmem:[%s4746_s16] sm:$0xf] }
 0x620   : > { %3002 = vrot.lane.b32.xlu0 %v4609_v32, %s3856_s18 }
 0x66e   : > { %v2469_v51 = vpop.permute.xlu0 %2468 }
 0x66f   : > { %v2472_v27 = vsel %vm2470_vm13, %v2467_v35, %v2469_v51  ;;  %v2478_v42 = vsel %vm2444_vm6, %v2469_v51, 0.0 }
 0x670   : > { %3569 = vmatprep.subr.msk.mxu1 %vm4636_vm14, %v2472_v27  ;;  %v2477_v36 = vsel %vm4636_vm14, %v2472_v27, 0.0 }
 0x671   : > { %3570 = vmatpush1.msk.msra.mxu1 %vm4642_vm15, %v2471_v19 }
 0x672   : > { %v2493_v3 = vpop.permute.xlu0 %2492  ;;  %3571 = vmatmul.mubr.msk.f32.vlgmr.msra.gmra.mxu1 %vm2509_vm12, %v4609_v32 }
 0x673   : > { %v2498_v26 = vsel %vm2496_vm0, %v2493_v3, %v4618_v31  ;;  %2815 = vmatprep.mubr.f32.mxu1 %v3845_v1 }
 0x674   : > { %3572 = vmatprep.subr.msk.mxu0 %vm2480_vm1, %v2498_v26  ;;  %v2503_v7 = vsel %vm2480_vm1, %v2498_v26, 0.0 }
 0x675   : > { %2919 = vrot.lane.b32.xlu0 %v2503_v7, %s3852_s23 }
 0x676   : > { %v2491_v59 = vpop.permute.xlu0 %2490 }
 0x677   : > { %v2497_v52 = vsel %vm2496_vm0, %v2491_v59, %v2493_v3 }
 0x678   : > { %3573 = vmatpush1.msk.msra.mxu0 %vm2479_vm2, %v2497_v52  ;;  %v2502_v50 = vsel %vm2479_vm2, %v2497_v52, 0.0 }
 0x679   : > { %2740 = vrot.lane.b32.xlu0 %v2477_v36, %s3852_s23  ;;  %2917 = vrot.lane.b32.xlu1 %v2502_v50, %s3852_s23 }
 0x67a   : > { %v2657_v18 = vpop.permute.xlu0 %2656 }
 0x67b   : > { %3574 = vmatmul.mubr.msk.f32.vlgmr.msra.gmra.mxu0 %vm2509_vm12, %v2657_v18 }
 0x67c   : > { %2903 = vmatprep.mubr.f32.mxu0 %v3845_v1 }
 0x67d   : > { %3180 = vrot.lane.b32.xlu0 %v2503_v7, %s3854_s29  ;;  %3095 = vrot.lane.b32.xlu1 %v4600_v48, %s3854_s29 }
 0x67e   : > { %v2830_v17 = vpop.permute.xlu0 %2829 }
 0x67f   : > { %v2833_v41 = vsel %vm2744_vm4, %v2828_v45, %v2830_v17  ;;  %v2834_v43 = vsel %vm2744_vm4, %v2830_v17, %v2832_v9 }
 0x680   : > { %2869 = vmatprep.subr.mxu0 %v2834_v43 }
 0x681   : > { %3006 = vrot.lane.b32.xlu0 %v2477_v36, %s3854_s29  ;;  %3091 = vrot.lane.b32.xlu1 %v4583_v62, %s3854_s29  ;;  %v3271_v62 = vld [vmem:[%s4743_s13] sm:$0xff] }
 0x682   : > { %2870 = vmatpush1.msra.mxu0 %v2833_v41  ;;  %v2734_v11 = vpop.permute.xlu0 %2733 }
 0x685   : > { %3089 = vrot.lane.b32.xlu0 %v4609_v32, %s3857_s19  ;;  %2921 = vrot.lane.b32.xlu1 %v2504_v13, %s3852_s23 }
 0x686   : > { %v2825_v53 = vpop.permute.xlu0 %2824 }
 0x687   : > { %3576 = vmatmul.mubr.msk.f32.vlgmr.msra.gmra.mxu0 %vm2509_vm12, %v2825_v53 }
 0x688   : > { %3080 = vmatprep.mubr.f32.mxu0 %v3845_v1 }
 0x689   : > { %3176 = vrot.lane.b32.xlu0 %v4609_v32, %s3858_s1  ;;  %2738 = vrot.lane.b32.xlu1 %v2476_v8, %s3852_s23 }
 0x68a   : > { %v2913_v58 = vpop.permute.xlu0 %2912 }
 0x68d   : > { %3274 = vperm.xlu0 %3753, %v3271_v62   ;;  %3004 = vrot.lane.b32.xlu1 %v2476_v8, %s3854_s29 }
 0x68e   : > { %v3094_v56 = vpop.permute.xlu0 %3093 }
 0x691   : > { %3293 = vperm.xlu0 %3753, %v3290_v0   ;;  %2742 = vrot.lane.b32.xlu1 %v2478_v42, %s3852_s23 }
 0x692   : > { %v3003_v2 = vpop.permute.xlu0 %3002 }
 0x695   : > { %3008 = vrot.lane.b32.xlu1 %v2478_v42, %s3854_s29 }
 0x699   : > { %3182 = vrot.lane.b32.xlu1 %v2504_v13, %s3854_s29 }
 0x69d   : > { %3178 = vrot.lane.b32.xlu1 %v2502_v50, %s3854_s29 }
 0x6a1   : > { %3266 = vperm.xlu1 %3754, %v3263_v60  }
 0x6a5   : > { %3282 = vperm.xlu1 %3754, %v3279_v37  }
 0x6c7   : > { %v2578_v35 = vpop.f32.mrf.mxu0 }
 0x6c9   : > { %v2580_v31 = vpop.f32.mrf.mxu0 }
 0x6e7   : > { %v2920_v47 = vpop.permute.xlu0 %2919 }
 0x6eb   : > { %v2918_v40 = vpop.permute.xlu1 %2917  ;;  %v2741_v57 = vpop.permute.xlu0 %2740 }
 0x6ec   : > { %v2923_v5 = vsel %vm2744_vm4, %v2918_v40, %v2920_v47 }
 0x6ef   : > { %v3096_v12 = vpop.permute.xlu1 %3095  ;;  %v3181_v6 = vpop.permute.xlu0 %3180 }
 0x6f0   : > { %v3098_v34 = vsel %vm1281_vm3, %v3094_v56, %v3096_v12 }
 0x6f3   : > { %v3092_v54 = vpop.permute.xlu1 %3091  ;;  %v3007_v29 = vpop.permute.xlu0 %3006 }
 0x6f4   : > { %v3097_v25 = vsel %vm1281_vm3, %v3092_v54, %v3094_v56 }
 0x6f7   : > { %v2922_v24 = vpop.permute.xlu1 %2921  ;;  %v3090_v39 = vpop.permute.xlu0 %3089 }
 0x6f8   : > { %v2924_v28 = vsel %vm2744_vm4, %v2920_v47, %v2922_v24 }
 0x6fb   : > { %v2739_v22 = vpop.permute.xlu1 %2738  ;;  %v3177_v4 = vpop.permute.xlu0 %3176 }
 0x6fc   : > { %v2745_v10 = vsel %vm2744_vm4, %v2739_v22, %v2741_v57 }
 0x6ff   : > { %v3005_v23 = vpop.permute.xlu1 %3004 }
 0x700   : > { %v3010_v48 = vsel %vm1281_vm3, %v3005_v23, %v3007_v29  ;;  %v3289_v23 = vld [vmem:[%s4745_s15] sm:$0xf] }
 0x703   : > { %v2743_v46 = vpop.permute.xlu1 %2742 }
 0x704   : > { %v2746_v49 = vsel %vm2744_vm4, %v2741_v57, %v2743_v46 }
 0x705   : > { %2781 = vmatprep.subr.mxu1 %v2746_v49 }
 0x706   : > { %2782 = vmatpush1.msra.mxu1 %v2745_v10 }
 0x707   : > { %v3009_v33 = vpop.permute.xlu1 %3008  ;;  %3575 = vmatmul.mubr.msk.f32.vlgmr.msra.gmra.mxu1 %vm2509_vm12, %v2734_v11  ;;  %2959 = vmatprep.subr.mxu1 %v2924_v28 }
 0x708   : > { %2960 = vmatpush1.msra.mxu1 %v2923_v5  ;;  %v3011_v63 = vsel %vm1281_vm3, %v3007_v29, %v3009_v33  ;;  %2993 = vmatprep.mubr.f32.mxu1 %v3845_v1  ;;  %v3275_v56 = vpop.permute.xlu0 %3274 }
 0x709   : > { %3046 = vmatprep.subr.mxu0 %v3011_v63  ;;  %3133 = vmatprep.subr.mxu1 %v3098_v34 }
 0x70a   : > { %3047 = vmatpush1.msra.mxu0 %v3010_v48 }
 0x70b   : > { %v3183_v55 = vpop.permute.xlu1 %3182  ;;  %3577 = vmatmul.mubr.msk.f32.vlgmr.msra.gmra.mxu1 %vm2509_vm12, %v2913_v58  ;;  %3578 = vmatmul.mubr.msk.f32.vlgmr.msra.gmra.mxu0 %vm2509_vm12, %v3003_v2 }
 0x70c   : > { %3134 = vmatpush1.msra.mxu1 %v3097_v25  ;;  %v3185_v32 = vsel %vm1281_vm3, %v3181_v6, %v3183_v55  ;;  %3167 = vmatprep.mubr.f32.mxu1 %v3845_v1  ;;  %v3294_v46 = vpop.permute.xlu0 %3293 }
 0x70d   : > { %3220 = vmatprep.subr.mxu0 %v3185_v32  ;;  %3254 = vmatprep.mubr.f32.mxu0 %v3845_v1 }
 0x70f   : > { %v3179_v16 = vpop.permute.xlu1 %3178  ;;  %3579 = vmatmul.mubr.msk.f32.vlgmr.msra.gmra.mxu1 %vm2509_vm12, %v3090_v39 }
 0x710   : > { %v3184_v14 = vsel %vm1281_vm3, %v3179_v16, %v3181_v6  ;;  %3363 = vmatprep.mubr.f32.mxu1 %v3845_v1 }
 0x711   : > { %3221 = vmatpush1.msra.mxu0 %v3184_v14 }
 0x712   : > { %3580 = vmatmul.mubr.msk.f32.vlgmr.msra.gmra.mxu0 %vm2509_vm12, %v3177_v4 }
 0x71c   : > { %v3267_v0 = vpop.permute.xlu1 %3266 }
 0x720   : > { %v3283_v12 = vpop.permute.xlu1 %3282 }
 0x732   : > { %v2651_v21 = vpop.f32.mrf.mxu1 }
 0x733   : > { %v2652_v44 = vadd.f32 %v2651_v21, %v2578_v35 }
 0x734   : > { %v2653_v38 = vpop.f32.mrf.mxu1 }
 0x735   : > { %v2654_v51 = vadd.f32 %v2653_v38, %v2580_v31 }
 0x73b   : > { %v2726_v30 = vpop.f32.mrf.mxu0 }
 0x73c   : > { %v2731_v19 = vadd.f32 %v2726_v30, %v2652_v44 }
 0x73d   : > { %v2728_v15 = vpop.f32.mrf.mxu0 }
 0x73e   : > { %v2732_v3 = vadd.f32 %v2728_v15, %v2654_v51 }
 0x747   : > { %v2905_v27 = vpop.f32.mrf.mxu0 }
 0x749   : > { %v2907_v7 = vpop.f32.mrf.mxu0 }
 0x7c7   : > { %v2817_v61 = vpop.f32.mrf.mxu1 }
 0x7c8   : > { %v2822_v26 = vadd.f32 %v2817_v61, %v2731_v19 }
 0x7c9   : > { %v2819_v59 = vpop.f32.mrf.mxu1 }
 0x7ca   : > { %v2823_v1 = vadd.f32 %v2819_v59, %v2732_v3  ;;  %v2910_v52 = vadd.f32 %v2905_v27, %v2822_v26 }
 0x7cb   : > { %v2995_v9 = vpop.f32.mrf.mxu1  ;;  %v3082_v36 = vpop.f32.mrf.mxu0 }
 0x7cc   : > { %v3000_v50 = vadd.f32 %v2995_v9, %v2910_v52  ;;  %v2911_v18 = vadd.f32 %v2907_v7, %v2823_v1 }
 0x7cd   : > { %v2997_v20 = vpop.f32.mrf.mxu1  ;;  %v3084_v41 = vpop.f32.mrf.mxu0 }
 0x7ce   : > { %v3087_v45 = vadd.f32 %v3082_v36, %v3000_v50  ;;  %v3001_v17 = vadd.f32 %v2997_v20, %v2911_v18 }
 0x7cf   : > { %v3169_v43 = vpop.f32.mrf.mxu1 }
 0x7d0   : > { %v3088_v11 = vadd.f32 %v3084_v41, %v3001_v17  ;;  %v3174_v13 = vadd.f32 %v3169_v43, %v3087_v45 }
 0x7d1   : > { %v3171_v53 = vpop.f32.mrf.mxu1 }
 0x7d2   : > { %v3175_v8 = vadd.f32 %v3171_v53, %v3088_v11  ;;  %v3256_v62 = vpop.f32.mrf.mxu0 }
 0x7d3   : > { %v3261_v42 = vadd.f32 %v3256_v62, %v3174_v13 }
 0x7d4   : > { %v3258_v60 = vpop.f32.mrf.mxu0 }
 0x7d5   : > { %v3269_v37 = vadd.f32 %v3267_v0, %v3261_v42  ;;  %v3262_v58 = vadd.f32 %v3258_v60, %v3175_v8 }
 0x7d7   : > { %v3277_v40 = vmul.f32 %v3275_v56, %v3269_v37  ;;  %v3270_v2 = vadd.f32 %v3267_v0, %v3262_v58 }
 0x7d9   : > { %v3278_v54 = vmul.f32 %v3275_v56, %v3270_v2  ;;  %v3285_v47 = vadd.f32 %v3283_v12, %v3277_v40 }
 0x7db   : > { %v3286_v24 = vadd.f32 %v3283_v12, %v3278_v54  ;;  %v3287_v22 = vmax.f32 %v3285_v47, 0.0 }
 0x7dd   : > { %v3288_v57 = vmax.f32 %v3286_v24, 0.0 }
 0x7df   : > { %3329 = vmatprep.subr.mxu1 %v3288_v57 }
 0x7e0   : > { %3330 = vmatpush1.msra.mxu1 %v3287_v22 }
 0x7e1   : > { %3581 = vmatmul.mubr.msk.f32.vlgmr.msra.gmra.mxu1 %vm2509_vm12, %v3289_v23 }
 0x8a1   : > { %v3365_v6 = vpop.f32.mrf.mxu1 }
 0x8a2   : > { %v3366_v10 = vadd.f32 %v3365_v6, %v3294_v46 }
 0x8a3   : > { %v3367_v49 = vpop.f32.mrf.mxu1 }
 0x8a4   : > { %v3368_v28 = vadd.f32 %v3367_v49, %v3294_v46 }
 0x8a6   : > { %v3372_v5 = vcombine.low %v3366_v10, %v3368_v28 }
 0x8a8   : > { %3374 = vst [vmem:[%s581_s28] sm:$0xff] %v3372_v5 }
 0x8a9 PF: > { %s27_s26 = sadd.s32 1, %s3843_s26   ;;  %s4757_s24 = smov %s3839_s25 }
 0x8aa   : > { %p24_p5 = scmp.ge.s32.totalorder %s27_s26, 4   ;;  %s4758_s25 = smov %s4760_s27 }
 0x8ac   :  { %26 = sbr.rel (!%p24_p5) target bundleno = 3 (0x3), region = 118 }

</bundles_post_ra>
